<compile_context>
chip_gen: v5e
topology: v5e:2x2
jax: 0.10.0
libtpu: 0.0.40
codegen_flags: <defaults>
</compile_context>

<pallas_src>
import jax
import jax.numpy as jnp
from jax.experimental import pallas as pl
from jax.experimental.pallas import tpu as pltpu

OUT_PAD = 128  # lane-dense padded width of the final layer (logical out_dim = 4)


def _mlp_kernel(x_ref, w1_ref, b1_ref, w2_ref, b2_ref, w3_ref, b3_ref, o_ref):
    # One (TM, :) row tile of the batch; all three matmuls fused.
    x = x_ref[...]                                                   # (TM, K) bf16
    h1 = jnp.dot(x, w1_ref[...], preferred_element_type=jnp.float32)
    h1 = jnp.maximum(h1 + b1_ref[...], 0.0).astype(jnp.bfloat16)     # (TM, 256)
    h2 = jnp.dot(h1, w2_ref[...], preferred_element_type=jnp.float32)
    h2 = jnp.maximum(h2 + b2_ref[...], 0.0).astype(jnp.bfloat16)     # (TM, 64)
    out = jnp.dot(h2, w3_ref[...], preferred_element_type=jnp.float32)
    o_ref[...] = (out + b3_ref[...]).astype(o_ref.dtype)             # (TM, 128) f32


def _round_up(x, m):
    return (x + m - 1) // m * m


def fizzbuzz_mlp(x, w1, b1, w2, b2, w3, b3, *, tm=512):
    """Forward pass of FizzBuzzModelV3.

    x: (B, num_digits) f32. Weights stored (in, out); biases (1, out), all f32.
    Returns (B, 4) f32.
    """
    B, K = x.shape
    H1, H2, OUT = w1.shape[1], w2.shape[1], w3.shape[1]

    # Lane-dense final layer: pad (64, 4) -> (64, 128), (1, 4) -> (1, 128).
    w3p = jnp.zeros((H2, OUT_PAD), w3.dtype).at[:, :OUT].set(w3)
    b3p = jnp.zeros((1, OUT_PAD), b3.dtype).at[:, :OUT].set(b3)

    # bf16 activations/weights for DMA + MXU; accumulation stays f32 in-kernel.
    xb = x.astype(jnp.bfloat16)
    w1b = w1.astype(jnp.bfloat16)
    w2b = w2.astype(jnp.bfloat16)
    w3b = w3p.astype(jnp.bfloat16)

    # Batch tiling: pad B up to a multiple of the row tile, run a 1-D grid.
    tm = min(tm, _round_up(B, 8))
    Bp = _round_up(B, tm)
    if Bp != B:
        xb = jnp.pad(xb, ((0, Bp - B), (0, 0)))
    grid = (Bp // tm,)

    def full(shape):
        # Whole-array block, pinned to block (0, 0) for every grid step
        # -> loaded into VMEM once and reused across all batch tiles.
        return pl.BlockSpec(shape, lambda i: (0,) * len(shape))

    flops = 2 * Bp * (K * H1 + H1 * H2 + H2 * OUT_PAD)
    bytes_accessed = (
        xb.size * 2                                   # bf16 input rows
        + (w1b.size + w2b.size + w3b.size) * 2        # bf16 weights
        + (b1.size + b2.size + b3p.size) * 4          # f32 biases
        + Bp * OUT_PAD * 4                            # f32 padded output
    )

    out_padded = pl.pallas_call(
        _mlp_kernel,
        out_shape=jax.ShapeDtypeStruct((Bp, OUT_PAD), jnp.float32),
        grid=grid,
        in_specs=[
            pl.BlockSpec((tm, K), lambda i: (i, 0)),   # x: one row tile per step
            full(w1b.shape), full(b1.shape),           # weights/biases: VMEM-resident
            full(w2b.shape), full(b2.shape),
            full(w3b.shape), full(b3p.shape),
        ],
        out_specs=pl.BlockSpec((tm, OUT_PAD), lambda i: (i, 0)),
        compiler_params=pltpu.CompilerParams(
            dimension_semantics=("parallel",)),        # megacore / v7x 2nd TC
        cost_estimate=pl.CostEstimate(
            flops=flops, transcendentals=0, bytes_accessed=bytes_accessed),
    )(xb, w1b, b1, w2b, b2, w3b, b3p)

    return out_padded[:B, :OUT]


def init_params(key, num_digits):
    # Mirrors FizzBuzzModelV3.init_weights(): N(0, 0.01) weights, zero biases.
    k1, k2, k3 = jax.random.split(key, 3)
    # PyTorch Linear weight is (out, in); we store transposed (in, out).
    w1 = (jax.random.normal(k1, (256, num_digits), jnp.float32) * 0.01).T
    w2 = (jax.random.normal(k2, (64, 256), jnp.float32) * 0.01).T
    w3 = (jax.random.normal(k3, (4, 64), jnp.float32) * 0.01).T
    b1 = jnp.zeros((1, 256), jnp.float32)
    b2 = jnp.zeros((1, 64), jnp.float32)
    b3 = jnp.zeros((1, 4), jnp.float32)
    return w1, b1, w2, b2, w3, b3


def reference(x, w1, b1, w2, b2, w3, b3, *, cast=jnp.float32):
    """Pure-JAX reference; cast=bfloat16 mimics the kernel's precision path."""
    xc = x.astype(cast)
    h1 = jnp.maximum(
        jnp.dot(xc, w1.astype(cast), preferred_element_type=jnp.float32) + b1, 0.0
    ).astype(cast)
    h2 = jnp.maximum(
        jnp.dot(h1, w2.astype(cast), preferred_element_type=jnp.float32) + b2, 0.0
    ).astype(cast)
    return jnp.dot(h2, w3.astype(cast), preferred_element_type=jnp.float32) + b3


if __name__ == "__main__":
    num_digits = 10
    batch = 1000  # classic FizzBuzz range; also exercises the batch-padding path

    key = jax.random.PRNGKey(0)
    kx, kp = jax.random.split(key)
    x = jax.random.normal(kx, (batch, num_digits), jnp.float32)
    params = init_params(kp, num_digits)

    out = jax.block_until_ready(fizzbuzz_mlp(x, *params))
    assert out.shape == (batch, 4), out.shape

    ref_bf16 = reference(x, *params, cast=jnp.bfloat16)  # same precision path
    ref_f32 = reference(x, *params, cast=jnp.float32)    # exact module semantics
    assert jnp.allclose(out, ref_bf16, atol=1e-5), "mismatch vs bf16-path reference"
    assert jnp.allclose(out, ref_f32, atol=1e-3), "mismatch vs f32 reference"

    print("KERNEL_OK")
</pallas_src>

<mosaic_0001>
module attributes {stable_mosaic.version = 11 : i64} {
  func.func @_mlp_kernel(%arg0: i32, %arg1: memref<512x10xbf16, #tpu.memory_space<vmem>>, %arg2: memref<10x256xbf16, #tpu.memory_space<vmem>>, %arg3: memref<1x256xf32, #tpu.memory_space<vmem>>, %arg4: memref<256x64xbf16, #tpu.memory_space<vmem>>, %arg5: memref<1x64xf32, #tpu.memory_space<vmem>>, %arg6: memref<64x128xbf16, #tpu.memory_space<vmem>>, %arg7: memref<1x128xf32, #tpu.memory_space<vmem>>, %arg8: memref<512x128xf32, #tpu.memory_space<vmem>>) attributes {dimension_semantics = [#tpu.dimension_semantics<parallel>], iteration_bounds = array<i64: 2>, scalar_prefetch = 0 : i64, scratch_operands = 0 : i64, tpu.core_type = #tpu.core_type<tc>, window_params = [{transform_indices = @transform_0, window_bounds = array<i64: 512, 10>}, {pipeline_mode = #tpu.pipeline_mode<synchronous>, transform_indices = @transform_1, window_bounds = array<i64: 10, 256>}, {pipeline_mode = #tpu.pipeline_mode<synchronous>, transform_indices = @transform_2, window_bounds = array<i64: 1, 256>}, {pipeline_mode = #tpu.pipeline_mode<synchronous>, transform_indices = @transform_3, window_bounds = array<i64: 256, 64>}, {pipeline_mode = #tpu.pipeline_mode<synchronous>, transform_indices = @transform_4, window_bounds = array<i64: 1, 64>}, {pipeline_mode = #tpu.pipeline_mode<synchronous>, transform_indices = @transform_5, window_bounds = array<i64: 64, 128>}, {pipeline_mode = #tpu.pipeline_mode<synchronous>, transform_indices = @transform_6, window_bounds = array<i64: 1, 128>}, {transform_indices = @transform_7, window_bounds = array<i64: 512, 128>}]} {
    %c0 = arith.constant 0 : index
    %c0_0 = arith.constant 0 : index
    %0 = vector.load %arg1[%c0, %c0_0] : memref<512x10xbf16, #tpu.memory_space<vmem>>, vector<512x10xbf16>
    %c0_1 = arith.constant 0 : index
    %c0_2 = arith.constant 0 : index
    %1 = vector.load %arg2[%c0_1, %c0_2] : memref<10x256xbf16, #tpu.memory_space<vmem>>, vector<10x256xbf16>
    %cst = arith.constant dense<0.000000e+00> : vector<512x256xf32>
    %2 = tpu.matmul %0, %1, %cst {dimension_numbers = #tpu.dot_dimension_numbers<[1], [0], [0], [1], [0, 0, 1, 1], [], []>} : vector<512x10xbf16>, vector<10x256xbf16>, vector<512x256xf32> -> vector<512x256xf32>
    %c0_3 = arith.constant 0 : index
    %c0_4 = arith.constant 0 : index
    %3 = vector.load %arg3[%c0_3, %c0_4] : memref<1x256xf32, #tpu.memory_space<vmem>>, vector<1x256xf32>
    %4 = vector.broadcast %3 : vector<1x256xf32> to vector<512x256xf32>
    %5 = arith.addf %2, %4 : vector<512x256xf32>
    %cst_5 = arith.constant 0.000000e+00 : f32
    %6 = vector.broadcast %cst_5 : f32 to vector<512x256xf32>
    %7 = arith.maximumf %5, %6 : vector<512x256xf32>
    %8 = arith.truncf %7 : vector<512x256xf32> to vector<512x256xbf16>
    %c0_6 = arith.constant 0 : index
    %c0_7 = arith.constant 0 : index
    %9 = vector.load %arg4[%c0_6, %c0_7] : memref<256x64xbf16, #tpu.memory_space<vmem>>, vector<256x64xbf16>
    %cst_8 = arith.constant dense<0.000000e+00> : vector<512x64xf32>
    %10 = tpu.matmul %8, %9, %cst_8 {dimension_numbers = #tpu.dot_dimension_numbers<[1], [0], [0], [1], [0, 0, 1, 1], [], []>} : vector<512x256xbf16>, vector<256x64xbf16>, vector<512x64xf32> -> vector<512x64xf32>
    %c0_9 = arith.constant 0 : index
    %c0_10 = arith.constant 0 : index
    %11 = vector.load %arg5[%c0_9, %c0_10] : memref<1x64xf32, #tpu.memory_space<vmem>>, vector<1x64xf32>
    %12 = vector.broadcast %11 : vector<1x64xf32> to vector<512x64xf32>
    %13 = arith.addf %10, %12 : vector<512x64xf32>
    %cst_11 = arith.constant 0.000000e+00 : f32
    %14 = vector.broadcast %cst_11 : f32 to vector<512x64xf32>
    %15 = arith.maximumf %13, %14 : vector<512x64xf32>
    %16 = arith.truncf %15 : vector<512x64xf32> to vector<512x64xbf16>
    %c0_12 = arith.constant 0 : index
    %c0_13 = arith.constant 0 : index
    %17 = vector.load %arg6[%c0_12, %c0_13] : memref<64x128xbf16, #tpu.memory_space<vmem>>, vector<64x128xbf16>
    %cst_14 = arith.constant dense<0.000000e+00> : vector<512x128xf32>
    %18 = tpu.matmul %16, %17, %cst_14 {dimension_numbers = #tpu.dot_dimension_numbers<[1], [0], [0], [1], [0, 0, 1, 1], [], []>} : vector<512x64xbf16>, vector<64x128xbf16>, vector<512x128xf32> -> vector<512x128xf32>
    %c0_15 = arith.constant 0 : index
    %c0_16 = arith.constant 0 : index
    %19 = vector.load %arg7[%c0_15, %c0_16] : memref<1x128xf32, #tpu.memory_space<vmem>>, vector<1x128xf32>
    %20 = vector.broadcast %19 : vector<1x128xf32> to vector<512x128xf32>
    %21 = arith.addf %18, %20 : vector<512x128xf32>
    %c0_17 = arith.constant 0 : index
    %c0_18 = arith.constant 0 : index
    %22 = vector.load %arg8[%c0_17, %c0_18] : memref<512x128xf32, #tpu.memory_space<vmem>>, vector<512x128xf32>
    tpu.vector_store %arg8[%c0_17, %c0_18], %21 {strides = array<i32>} : memref<512x128xf32, #tpu.memory_space<vmem>>, vector<512x128xf32>,
    return
  }
  func.func @transform_0(%arg0: i32) -> (i32, i32) {
    %c0_i32 = arith.constant 0 : i32
    %c0_i32_0 = arith.constant 0 : i32
    return %arg0, %c0_i32 : i32, i32
  }
  func.func @transform_1(%arg0: i32) -> (i32, i32) {
    %c0_i32 = arith.constant 0 : i32
    %c0_i32_0 = arith.constant 0 : i32
    %c0_i32_1 = arith.constant 0 : i32
    return %c0_i32, %c0_i32_0 : i32, i32
  }
  func.func @transform_2(%arg0: i32) -> (i32, i32) {
    %c0_i32 = arith.constant 0 : i32
    %c0_i32_0 = arith.constant 0 : i32
    %c0_i32_1 = arith.constant 0 : i32
    return %c0_i32, %c0_i32_0 : i32, i32
  }
  func.func @transform_3(%arg0: i32) -> (i32, i32) {
    %c0_i32 = arith.constant 0 : i32
    %c0_i32_0 = arith.constant 0 : i32
    %c0_i32_1 = arith.constant 0 : i32
    return %c0_i32, %c0_i32_0 : i32, i32
  }
  func.func @transform_4(%arg0: i32) -> (i32, i32) {
    %c0_i32 = arith.constant 0 : i32
    %c0_i32_0 = arith.constant 0 : i32
    %c0_i32_1 = arith.constant 0 : i32
    return %c0_i32, %c0_i32_0 : i32, i32
  }
  func.func @transform_5(%arg0: i32) -> (i32, i32) {
    %c0_i32 = arith.constant 0 : i32
    %c0_i32_0 = arith.constant 0 : i32
    %c0_i32_1 = arith.constant 0 : i32
    return %c0_i32, %c0_i32_0 : i32, i32
  }
  func.func @transform_6(%arg0: i32) -> (i32, i32) {
    %c0_i32 = arith.constant 0 : i32
    %c0_i32_0 = arith.constant 0 : i32
    %c0_i32_1 = arith.constant 0 : i32
    return %c0_i32, %c0_i32_0 : i32, i32
  }
  func.func @transform_7(%arg0: i32) -> (i32, i32) {
    %c0_i32 = arith.constant 0 : i32
    %c0_i32_0 = arith.constant 0 : i32
    return %arg0, %c0_i32 : i32, i32
  }
}

</mosaic_0001>

<bundles_post_ra>
// kernel: tpu_custom_call.1
= control target key start
LH: loop header
LB: loop body
LE: loop exit
PB: predicated region body
PF: predicated region fallthrough
CT: control target
= control target key end

     0   :  { %12 = vsyncpa [#allocation3], 0  ;;  %s3727_s0 = inlined_call_operand.vmem [shape: bf16[1024,10], index: 0, kind: input, shape index: {}]   ;;  %s3728_s1 = inlined_call_operand.vmem [shape: bf16[10,256], index: 1, kind: input, shape index: {}]   ;;  %s3729_s2 = inlined_call_operand.vmem [shape: f32[1,256], index: 2, kind: input, shape index: {}]   ;;  %s3730_s3 = inlined_call_operand.vmem [shape: bf16[256,64], index: 3, kind: input, shape index: {}]   ;;  %s3731_s4 = inlined_call_operand.vmem [shape: f32[1,64], index: 4, kind: input, shape index: {}]   ;;  %s3732_s5 = inlined_call_operand.vmem [shape: bf16[64,128], index: 5, kind: input, shape index: {}]   ;;  %s3733_s6 = inlined_call_operand.vmem [shape: f32[1,128], index: 6, kind: input, shape index: {}]   ;;  %s3734_s7 = inlined_call_operand.hbm [shape: f32[1024,128], index: 7, kind: output, shape index: {}]  }
   0x1   :  { %14 = vsyncpa [#allocation3 + $0x1], 0  ;;  %s2712_s24 = smov 0   ;;  %s2714_s25 = smov 0  }
   0x2   :  { %s2716_s26 = smov 0   ;;  %s2718_s27 = smov 0  }
   0x3 LB: > { %s2733_s28 = sadd.s32 4294967295, %s2668_s27   ;;  %s2165_s29 = sadd.s32 4294967294, %s2668_s27   ;;  %s2668_s27 = sphi %s2718_s27, %s3740_s27   ;;  %s2664_s26 = sphi %s2716_s26, %s3739_s26   ;;  %s2660_s25 = sphi %s2714_s25, %s3738_s25   ;;  %s2656_s24 = sphi %s2712_s24, %s3737_s24  }
   0x4   : > { %s2737_s30 = sadd.s32 1, %s2668_s27   ;;  %s179_s8 = sadd.s32 1, %s2664_s26 }
   0x5   : > { %s176_s9 = ssub.s32 %s2668_s27, %s2737_s30  ;;  %p189_p0 = scmp.ne.s32.totalorder %s2664_s26, %s2660_s25 }
   0x6   : > { %p177_p1 = scmp.eq.s32.totalorder %s176_s9, 0  ;;  %p190_p2 = scmp.eq.s32.totalorder %s2733_s28, 1 }
   0x7   : > { %p195_p3 = scmp.ne.s32.totalorder %s2660_s25, %s2656_s24  ;;  %p196_p4 = scmp.eq.s32.totalorder %s2165_s29, 1 }
   0x8   : > { %s2748_s10 = scalar_select %p177_p1, %s2664_s26, %s179_s8  }
   0x9   : > { %p2750_p5 = por %p190_p2, %p189_p0  ;;  %p2754_p6 = por %p196_p4, %p195_p3 }
   0xa   : > { %p2168_p7 = scmp.ge.s32.totalorder %s2668_s27, 1  ;;  %p241_p8 = scmp.lt.s32.totalorder %s2668_s27, 3 }
   0xc   : > { %p242_p9 = pnand %p2168_p7, %p241_p8 }
   0xd   : > { %s2170_s17 = sshll.u32 (!%p242_p9), %s2733_s28, 6  ;;  %s2543_s9 = sshll.u32 (!%p242_p9), %s2733_s28, 9 }
   0xe   : > { %245 = sbr.rel (%p242_p9) target bundleno = 1098 (0x44a), region = 48  ;;  %p274_p10 = scmp.lt.s32.totalorder (!%p242_p9), %s2170_s17, 127 }
   0xf   : > { %s2099_s15 = scalar_lea.hbm (!%p242_p9), %s3734_s7, %s2543_s9  ;;  %s2626_s23 = scalar_lea.hbm (!%p242_p9), %s3734_s7, 1024 }
  0x13   : > { %v2302_v0 = vld [vmem:[%s3728_s1] sm:$0xf]  ;;  %v2522_v1 = vld [vmem:[%s3728_s1 + $0x4] sm:$0x10]  ;;  %vm618_vm0 = vcmask 1044480   ;;  %s3742_s17 = smov (!%p274_p10, %s2170_s17), 127 }
  0x14   : > { %v2303_v2 = vor.u32 %v2522_v1, %v2302_v0  ;;  %v2521_v3 = vld [vmem:[%s3728_s1 + $0x4] sm:$0xf]  ;;  %v2304_v4 = vld [vmem:[%s3728_s1 + $0x8] sm:$0x10]  ;;  %s2171_s22 = sshll.u32 %s3742_s17, 2  ;;  %vm521_vm1 = vcmask 80896  }
  0x15   : > { %v2307_v5 = vor.u32 %v2521_v3, %v2304_v4  ;;  %s2776_s8 = scalar_lea.vmem %s3727_s0, %s2171_s22  ;;  %v2530_v23 = vld [vmem:[%s3730_s3 + $0x38] sm:$0xff]  ;;  %v2529_v27 = vld [vmem:[%s3730_s3 + $0x30] sm:$0xff]  ;;  %v2528_v28 = vld [vmem:[%s3730_s3 + $0x28] sm:$0xff]  ;;  %vm1757_vm2 = vcmask 523264   ;;  %s270_s17 = sand.u32 1, %s2660_s25  }
  0x16   : > { %v620_v6 = vsel %vm618_vm0, %v2303_v2, 0  ;;  %v2779_v8 = vld [vmem:[%s2776_s8] sm:$0xff]  ;;  %v2782_v9 = vld [vmem:[%s2776_s8 + $0x48] sm:$0xff]  ;;  %v2785_v10 = vld [vmem:[%s2776_s8 + $0x90] sm:$0xff]  ;;  %s2169_s18 = sshll.u32 %s270_s17, 9  ;;  %s2088_s19 = scalar_lea.sflag [#allocation3], %s270_s17 }
  0x17   : > { %632 = vmatpush.bf16.msra.mxu0 %v620_v6  ;;  %2544 = vmatpush.bf16.msra.mxu1 %v620_v6  ;;  %v623_v7 = vsel %vm618_vm0, %v2307_v5, 0  ;;  %v2794_v11 = vld [vmem:[%s2776_s8 + $0x8] sm:$0xff]  ;;  %v2797_v12 = vld [vmem:[%s2776_s8 + $0x50] sm:$0xff]  ;;  %v2800_v13 = vld [vmem:[%s2776_s8 + $0x98] sm:$0xff]  ;;  %s3368_s21 = scalar_lea.vmem [#allocation2], %s2169_s18  ;;  %s2102_s18 = sshll.u32 %s2099_s15, 4  ;;  %s2103_s18 = int_to_ptr.hbm [resolvable:$true] %s2102_s18 }
  0x18   : > { %2545 = vmatpush.bf16.msra.mxu2 %v620_v6  ;;  %2546 = vmatpush.bf16.msra.mxu3 %v620_v6  ;;  %v2809_v14 = vld [vmem:[%s2776_s8 + $0x10] sm:$0xff]  ;;  %v2812_v15 = vld [vmem:[%s2776_s8 + $0x58] sm:$0xff]  ;;  %v2815_v16 = vld [vmem:[%s2776_s8 + $0xa0] sm:$0xff]  ;;  %s2100_s16 = sshll.u32 %s3368_s21, 4  ;;  %s2620_s28 = sshra.s32 %s2103_s18, 4  ;;  %s2101_s16 = int_to_ptr.vmem [resolvable:$true] %s2100_s16  ;;  %s2621_s28 = int_to_ptr.hbm [resolvable:$true] %s2620_s28 }
  0x19   : > { %v2824_v17 = vld [vmem:[%s2776_s8 + $0x18] sm:$0xff]  ;;  %v2827_v18 = vld [vmem:[%s2776_s8 + $0x60] sm:$0xff]  ;;  %v2830_v19 = vld [vmem:[%s2776_s8 + $0xa8] sm:$0xff]  ;;  %s2622_s20 = scalar_lea.hbm %s2621_s28, 512  ;;  %p2627_p0 = scmp.lt.s32.totalorder %s2621_s28, %s3734_s7 }
  0x1a   : > { %2308 = vmatmul.msk.bf16.vlgmr.msra.gmra.mxu0 %vm521_vm1, %v2779_v8  ;;  %2317 = vmatmul.msk.bf16.vlgmr.msra.gmra.mxu1 %vm521_vm1, %v2782_v9  ;;  %v2839_v20 = vld [vmem:[%s2776_s8 + $0x20] sm:$0xff]  ;;  %v2842_v21 = vld [vmem:[%s2776_s8 + $0x68] sm:$0xff]  ;;  %v2511_v22 = vld [vmem:[%s2776_s8 + $0xb0] sm:$0xff]  ;;  %p2623_p11 = scmp.ne.s32.totalorder %s2621_s28, %s2622_s20  ;;  %p2628_p1 = scmp.lt.s32.totalorder %s2626_s23, %s2622_s20 }
  0x1b   : > { %801 = vmatpush.bf16.msrb.mxu1 %v623_v7  ;;  %2326 = vmatmul.msk.bf16.vlgmr.msra.gmra.mxu2 %vm521_vm1, %v2785_v10  ;;  %v2854_v24 = vld [vmem:[%s2776_s8 + $0x28] sm:$0xff]  ;;  %v2857_v25 = vld [vmem:[%s2776_s8 + $0x70] sm:$0xff]  ;;  %v2512_v26 = vld [vmem:[%s2776_s8 + $0xb8] sm:$0xff] }
  0x1c   : > { %1287 = vmatpush.bf16.msrb.mxu2 %v2530_v23  ;;  %v2527_v29 = vld [vmem:[%s3730_s3 + $0x20] sm:$0xff]  ;;  %v2526_v30 = vld [vmem:[%s3730_s3 + $0x18] sm:$0xff]  ;;  %v2878_v31 = vld [vmem:[%s2776_s8 + $0x30] sm:$0xff]  ;;  %p2624_p12 = pnand %p2623_p11, %p2750_p5  ;;  %p2629_p2 = por %p2628_p1, %p2627_p0 }
  0x1d   : > { %v2881_v32 = vld [vmem:[%s2776_s8 + $0x78] sm:$0xff]  ;;  %v2513_v33 = vld [vmem:[%s2776_s8 + $0xc0] sm:$0xff]  ;;  %v2525_v34 = vld [vmem:[%s3730_s3 + $0x10] sm:$0xff] }
  0x1e   : > { %v2524_v35 = vld [vmem:[%s3730_s3 + $0x8] sm:$0xff]  ;;  %v2523_v36 = vld [vmem:[%s3730_s3] sm:$0xff]  ;;  %v2899_v37 = vld [vmem:[%s2776_s8 + $0x38] sm:$0xff]  ;;  %p2625_p13 = pneg %p2624_p12 }
  0x1f   : > { %v2902_v38 = vld [vmem:[%s2776_s8 + $0x80] sm:$0xff]  ;;  %v2514_v39 = vld [vmem:[%s2776_s8 + $0xc8] sm:$0xff]  ;;  %v2515_v62 = vld [vmem:[%s2776_s8 + $0xd0] sm:$0xff] }
  0x20   : > { %1288 = vmatpush.bf16.msrb.mxu2 %v2529_v27  ;;  %v2911_v40 = vld [vmem:[%s2776_s8 + $0x40] sm:$0xff]  ;;  %v2914_v41 = vld [vmem:[%s2776_s8 + $0x88] sm:$0xff]  ;;  %2334 = vmatmul.msk.bf16.vlgmr.msra.gmra.mxu3 %vm521_vm1, %v2515_v62  ;;  %p2630_p3 = pnand %p2629_p2, %p2625_p13 }
  0x21   : > { %v2919_v42 = vld [vmem:[%s3729_s2] sm:$0x3] }
  0x22   : > { %v2922_v45 = vperm.slane %v2919_v42, 0 }
  0x24   : > { %1289 = vmatpush.bf16.msrb.mxu2 %v2528_v28  ;;  %v2538_v28 = vld [vmem:[%s3730_s3 + $0x78] sm:$0xff] }
  0x25   : > { %1456 = vmatpush.bf16.msrb.mxu3 %v2538_v28 }
  0x28   : > { %1290 = vmatpush.bf16.msrb.mxu2 %v2527_v29 }
  0x2a   : > { %2309 = vmatmul.msk.bf16.gmra.mxu0 %vm521_vm1, %v2794_v11  ;;  %2318 = vmatmul.msk.bf16.gmra.mxu1 %vm521_vm1, %v2797_v12 }
  0x2b   : > { %2327 = vmatmul.msk.bf16.gmra.mxu2 %vm521_vm1, %v2800_v13 }
  0x2c   : > { %1291 = vmatpush.bf16.msrb.mxu2 %v2526_v30 }
  0x30   : > { %1292 = vmatpush.bf16.msrb.mxu2 %v2525_v34 }
  0x34   : > { %1293 = vmatpush.bf16.msrb.mxu2 %v2524_v35 }
  0x38   : > { %1294 = vmatpush.bf16.msrb.mxu2 %v2523_v36 }
  0x3a   : > { %2310 = vmatmul.msk.bf16.gmra.mxu0 %vm521_vm1, %v2809_v14  ;;  %2319 = vmatmul.msk.bf16.gmra.mxu1 %vm521_vm1, %v2812_v15 }
  0x3b   : > { %2328 = vmatmul.msk.bf16.gmra.mxu2 %vm521_vm1, %v2815_v16 }
  0x4a   : > { %2311 = vmatmul.msk.bf16.gmra.mxu0 %vm521_vm1, %v2824_v17  ;;  %2320 = vmatmul.msk.bf16.gmra.mxu1 %vm521_vm1, %v2827_v18 }
  0x4b   : > { %2329 = vmatmul.msk.bf16.gmra.mxu2 %vm521_vm1, %v2830_v19 }
  0x5a   : > { %2312 = vmatmul.msk.bf16.gmra.mxu0 %vm521_vm1, %v2839_v20  ;;  %2321 = vmatmul.msk.bf16.gmra.mxu1 %vm521_vm1, %v2842_v21 }
  0x5b   : > { %2330 = vmatmul.msk.bf16.gmra.mxu2 %vm521_vm1, %v2511_v22 }
  0x6a   : > { %2313 = vmatmul.msk.bf16.gmra.mxu0 %vm521_vm1, %v2854_v24  ;;  %2322 = vmatmul.msk.bf16.gmra.mxu1 %vm521_vm1, %v2857_v25 }
  0x6b   : > { %2331 = vmatmul.msk.bf16.gmra.mxu2 %vm521_vm1, %v2512_v26 }
  0x7a   : > { %2314 = vmatmul.msk.bf16.gmra.mxu0 %vm521_vm1, %v2878_v31  ;;  %2323 = vmatmul.msk.bf16.gmra.mxu1 %vm521_vm1, %v2881_v32 }
  0x7b   : > { %2332 = vmatmul.msk.bf16.gmra.mxu2 %vm521_vm1, %v2513_v33  ;;  %v2516_v33 = vld [vmem:[%s2776_s8 + $0xd8] sm:$0xff] }
  0x7c   : > { %2335 = vmatmul.msk.bf16.gmra.mxu3 %vm521_vm1, %v2516_v33  ;;  %v2518_v33 = vld [vmem:[%s2776_s8 + $0xe8] sm:$0xff] }
  0x8a   : > { %2315 = vmatmul.msk.bf16.gmra.mxu0 %vm521_vm1, %v2899_v37  ;;  %2324 = vmatmul.msk.bf16.gmra.mxu1 %vm521_vm1, %v2902_v38 }
  0x8b   : > { %2333 = vmatmul.msk.bf16.gmra.mxu2 %vm521_vm1, %v2514_v39 }
  0x97   : > { %v634_v43 = vpop.f32.mrf.mxu0  ;;  %v679_v44 = vpop.f32.mrf.mxu1 }
  0x98   : > { %v635_v46 = vadd.f32 %v634_v43, %v2922_v45  ;;  %v680_v47 = vadd.f32 %v679_v44, %v2922_v45 }
  0x9a   : > { %2316 = vmatmul.msk.bf16.gmra.mxu0 %vm521_vm1, %v2911_v40  ;;  %2325 = vmatmul.msk.bf16.gmra.mxu1 %vm521_vm1, %v2914_v41  ;;  %v963_v51 = vmax.f32 %v635_v46, 0.0  ;;  %v999_v54 = vmax.f32 %v680_v47, 0.0 }
  0x9e   : > { %v2930_v48 = vpop.f32.mrf.mxu2 }
  0x9f   : > { %v636_v49 = vpop.f32.mrf.mxu0  ;;  %v681_v50 = vpop.f32.mrf.mxu1 }
  0xa0   : > { %v637_v52 = vadd.f32 %v636_v49, %v2922_v45  ;;  %v682_v53 = vadd.f32 %v681_v50, %v2922_v45 }
  0xa2   : > { %v965_v55 = vmax.f32 %v637_v52, 0.0  ;;  %v1001_v56 = vmax.f32 %v682_v53, 0.0 }
  0xa4   : > { %v1091_v57 = vpack.c.bf16 %v965_v55, %v963_v51  ;;  %v2934_v58 = vpack.c.bf16 %v1001_v56, %v999_v54  ;;  %v2537_v51 = vld [vmem:[%s3730_s3 + $0x70] sm:$0xff] }
  0xa5   : > { %1457 = vmatpush.bf16.msrb.mxu3 %v2537_v51 }
  0xa6   : > { %1295 = vmatmul.bf16.vlgmr.msrb.gmra.mxu2 %v1091_v57  ;;  %v2936_v59 = vpop.f32.mrf.mxu2  ;;  %v2517_v57 = vld [vmem:[%s2776_s8 + $0xe0] sm:$0xff] }
  0xa7   : > { %v639_v60 = vpop.f32.mrf.mxu0  ;;  %v684_v61 = vpop.f32.mrf.mxu1  ;;  %2336 = vmatmul.msk.bf16.gmra.mxu3 %vm521_vm1, %v2517_v57 }
  0xa8   : > { %v640_v63 = vadd.f32 %v639_v60, %v2922_v45  ;;  %v685_v0 = vadd.f32 %v684_v61, %v2922_v45  ;;  %v2536_v60 = vld [vmem:[%s3730_s3 + $0x68] sm:$0xff] }
  0xa9   : > { %1458 = vmatpush.bf16.msrb.mxu3 %v2536_v60 }
  0xaa   : > { %2340 = vmatmul.msk.bf16.vlgmr.msrb.gmra.mxu1 %vm521_vm1, %v2779_v8  ;;  %v967_v4 = vmax.f32 %v640_v63, 0.0  ;;  %v1003_v7 = vmax.f32 %v685_v0, 0.0 }
  0xae   : > { %v2944_v1 = vpop.f32.mrf.mxu2 }
  0xaf   : > { %v641_v2 = vpop.f32.mrf.mxu0  ;;  %v686_v3 = vpop.f32.mrf.mxu1 }
  0xb0   : > { %v642_v5 = vadd.f32 %v641_v2, %v2922_v45  ;;  %v687_v6 = vadd.f32 %v686_v3, %v2922_v45 }
  0xb2   : > { %v969_v22 = vmax.f32 %v642_v5, 0.0  ;;  %v1005_v8 = vmax.f32 %v687_v6, 0.0 }
  0xb4   : > { %v1093_v23 = vpack.c.bf16 %v969_v22, %v967_v4  ;;  %v2948_v26 = vpack.c.bf16 %v1005_v8, %v1003_v7 }
  0xb6   : > { %1300 = vmatmul.bf16.gmra.mxu2 %v1093_v23  ;;  %v2950_v27 = vpop.f32.mrf.mxu2 }
  0xb7   : > { %v644_v29 = vpop.f32.mrf.mxu0  ;;  %v689_v30 = vpop.f32.mrf.mxu1  ;;  %2337 = vmatmul.msk.bf16.gmra.mxu3 %vm521_vm1, %v2518_v33 }
  0xb8   : > { %v645_v34 = vadd.f32 %v644_v29, %v2922_v45  ;;  %v690_v35 = vadd.f32 %v689_v30, %v2922_v45  ;;  %v2535_v30 = vld [vmem:[%s3730_s3 + $0x60] sm:$0xff] }
  0xb9   : > { %1459 = vmatpush.bf16.msrb.mxu3 %v2535_v30 }
  0xba   : > { %2341 = vmatmul.msk.bf16.gmra.mxu1 %vm521_vm1, %v2794_v11  ;;  %v971_v44 = vmax.f32 %v645_v34, 0.0  ;;  %v1007_v49 = vmax.f32 %v690_v35, 0.0 }
  0xbe   : > { %v2961_v36 = vpop.f32.mrf.mxu2 }
  0xbf   : > { %v646_v39 = vpop.f32.mrf.mxu0  ;;  %v691_v43 = vpop.f32.mrf.mxu1 }
  0xc0   : > { %v647_v46 = vadd.f32 %v646_v39, %v2922_v45  ;;  %v692_v47 = vadd.f32 %v691_v43, %v2922_v45 }
  0xc2   : > { %v973_v50 = vmax.f32 %v647_v46, 0.0  ;;  %v1009_v11 = vmax.f32 %v692_v47, 0.0 }
  0xc4   : > { %v1095_v52 = vpack.c.bf16 %v973_v50, %v971_v44  ;;  %v2968_v53 = vpack.c.bf16 %v1009_v11, %v1007_v49 }
  0xc6   : > { %1305 = vmatmul.bf16.gmra.mxu2 %v1095_v52  ;;  %v2970_v54 = vpop.f32.mrf.mxu2 }
  0xc7   : > { %v649_v55 = vpop.f32.mrf.mxu0  ;;  %v694_v56 = vpop.f32.mrf.mxu1 }
  0xc8   : > { %v650_v61 = vadd.f32 %v649_v55, %v2922_v45  ;;  %v695_v62 = vadd.f32 %v694_v56, %v2922_v45  ;;  %v2534_v56 = vld [vmem:[%s3730_s3 + $0x58] sm:$0xff] }
  0xc9   : > { %1460 = vmatpush.bf16.msrb.mxu3 %v2534_v56 }
  0xca   : > { %2342 = vmatmul.msk.bf16.gmra.mxu1 %vm521_vm1, %v2809_v14  ;;  %v975_v3 = vmax.f32 %v650_v61, 0.0  ;;  %v1011_v5 = vmax.f32 %v695_v62, 0.0  ;;  %v2519_v61 = vld [vmem:[%s2776_s8 + $0xf0] sm:$0xff] }
  0xcb   : > { %2338 = vmatmul.msk.bf16.gmra.mxu3 %vm521_vm1, %v2519_v61 }
  0xce   : > { %v2981_v63 = vpop.f32.mrf.mxu2 }
  0xcf   : > { %v651_v0 = vpop.f32.mrf.mxu0  ;;  %v696_v2 = vpop.f32.mrf.mxu1 }
  0xd0   : > { %v652_v14 = vadd.f32 %v651_v0, %v2922_v45  ;;  %v697_v4 = vadd.f32 %v696_v2, %v2922_v45 }
  0xd2   : > { %v977_v6 = vmax.f32 %v652_v14, 0.0  ;;  %v1013_v7 = vmax.f32 %v697_v4, 0.0 }
  0xd4   : > { %v1097_v22 = vpack.c.bf16 %v977_v6, %v975_v3  ;;  %v2985_v8 = vpack.c.bf16 %v1013_v7, %v1011_v5 }
  0xd6   : > { %1310 = vmatmul.bf16.gmra.mxu2 %v1097_v22  ;;  %v2987_v23 = vpop.f32.mrf.mxu2 }
  0xd7   : > { %v654_v28 = vpop.f32.mrf.mxu0  ;;  %v699_v29 = vpop.f32.mrf.mxu1 }
  0xd8   : > { %v655_v34 = vadd.f32 %v654_v28, %v2922_v45  ;;  %v700_v35 = vadd.f32 %v699_v29, %v2922_v45  ;;  %v2533_v28 = vld [vmem:[%s3730_s3 + $0x50] sm:$0xff] }
  0xd9   : > { %1461 = vmatpush.bf16.msrb.mxu3 %v2533_v28 }
  0xda   : > { %2343 = vmatmul.msk.bf16.gmra.mxu1 %vm521_vm1, %v2824_v17  ;;  %v979_v46 = vmax.f32 %v655_v34, 0.0  ;;  %v1015_v49 = vmax.f32 %v700_v35, 0.0 }
  0xde   : > { %v2998_v39 = vpop.f32.mrf.mxu2 }
  0xdf   : > { %v656_v43 = vpop.f32.mrf.mxu0  ;;  %v701_v44 = vpop.f32.mrf.mxu1 }
  0xe0   : > { %v657_v17 = vadd.f32 %v656_v43, %v2922_v45  ;;  %v702_v47 = vadd.f32 %v701_v44, %v2922_v45  ;;  %v2520_v43 = vld [vmem:[%s2776_s8 + $0xf8] sm:$0xff]  ;;  %v2532_v44 = vld [vmem:[%s3730_s3 + $0x48] sm:$0xff] }
  0xe1   : > { %1462 = vmatpush.bf16.msrb.mxu3 %v2532_v44  ;;  %v727_v44 = vadd.f32 %v2936_v59, %v2922_v45 }
  0xe2   : > { %v981_v50 = vmax.f32 %v657_v17, 0.0  ;;  %v1017_v11 = vmax.f32 %v702_v47, 0.0  ;;  %2339 = vmatmul.msk.bf16.gmra.mxu3 %vm521_vm1, %v2520_v43  ;;  %v725_v43 = vadd.f32 %v2930_v48, %v2922_v45 }
  0xe4   : > { %v1099_v51 = vpack.c.bf16 %v981_v50, %v979_v46  ;;  %v3002_v52 = vpack.c.bf16 %v1017_v11, %v1015_v49 }
  0xe6   : > { %1315 = vmatmul.bf16.gmra.mxu2 %v1099_v51  ;;  %v3004_v55 = vpop.f32.mrf.mxu2 }
  0xe7   : > { %v659_v57 = vpop.f32.mrf.mxu0  ;;  %v704_v60 = vpop.f32.mrf.mxu1 }
  0xe8   : > { %v660_v62 = vadd.f32 %v659_v57, %v2922_v45  ;;  %v705_v0 = vadd.f32 %v704_v60, %v2922_v45 }
  0xea   : > { %2344 = vmatmul.msk.bf16.gmra.mxu1 %vm521_vm1, %v2839_v20  ;;  %v983_v4 = vmax.f32 %v660_v62, 0.0  ;;  %v1019_v7 = vmax.f32 %v705_v0, 0.0 }
  0xee   : > { %v3015_v2 = vpop.f32.mrf.mxu2 }
  0xef   : > { %v661_v3 = vpop.f32.mrf.mxu0  ;;  %v706_v14 = vpop.f32.mrf.mxu1 }
  0xf0   : > { %v662_v5 = vadd.f32 %v661_v3, %v2922_v45  ;;  %v707_v6 = vadd.f32 %v706_v14, %v2922_v45 }
  0xf2   : > { %v985_v22 = vmax.f32 %v662_v5, 0.0  ;;  %v1021_v20 = vmax.f32 %v707_v6, 0.0 }
  0xf4   : > { %v1101_v29 = vpack.c.bf16 %v985_v22, %v983_v4  ;;  %v3022_v30 = vpack.c.bf16 %v1021_v20, %v1019_v7  ;;  %v2531_v4 = vld [vmem:[%s3730_s3 + $0x40] sm:$0xff] }
  0xf5   : > { %1463 = vmatpush.bf16.msrb.mxu3 %v2531_v4 }
  0xf6   : > { %1320 = vmatmul.bf16.gmra.mxu2 %v1101_v29  ;;  %v3024_v33 = vpop.f32.mrf.mxu2 }
  0xf7   : > { %v664_v34 = vpop.f32.mrf.mxu0  ;;  %v709_v35 = vpop.f32.mrf.mxu1 }
  0xf8   : > { %v665_v46 = vadd.f32 %v664_v34, %v2922_v45  ;;  %v710_v17 = vadd.f32 %v709_v35, %v2922_v45 }
  0xfa   : > { %2345 = vmatmul.msk.bf16.gmra.mxu1 %vm521_vm1, %v2854_v24  ;;  %v987_v50 = vmax.f32 %v665_v46, 0.0  ;;  %v1023_v56 = vmax.f32 %v710_v17, 0.0 }
  0xfe   : > { %v3037_v24 = vpop.f32.mrf.mxu2 }
  0xff   : > { %v666_v47 = vpop.f32.mrf.mxu0  ;;  %v711_v49 = vpop.f32.mrf.mxu1 }
 0x100   : > { %v667_v11 = vadd.f32 %v666_v47, %v2922_v45  ;;  %v712_v51 = vadd.f32 %v711_v49, %v2922_v45 }
 0x102   : > { %v989_v57 = vmax.f32 %v667_v11, 0.0  ;;  %v1025_v60 = vmax.f32 %v712_v51, 0.0  ;;  %v1035_v11 = vmax.f32 %v725_v43, 0.0  ;;  %v1037_v51 = vmax.f32 %v727_v44, 0.0 }
 0x103   : > { %v3079_v43 = vperm.slane %v2919_v42, 1 }
 0x104   : > { %v1103_v61 = vpack.c.bf16 %v989_v57, %v987_v50  ;;  %v3039_v62 = vpack.c.bf16 %v1025_v60, %v1023_v56  ;;  %v3063_v57 = vpack.c.bf16 %v1037_v51, %v1035_v11  ;;  %v737_v51 = vadd.f32 %v2970_v54, %v2922_v45 }
 0x106   : > { %1325 = vmatmul.bf16.gmra.mxu2 %v1103_v61  ;;  %v3043_v14 = vpop.f32.mrf.mxu2 }
 0x107   : > { %v669_v0 = vpop.f32.mrf.mxu0  ;;  %v714_v3 = vpop.f32.mrf.mxu1 }
 0x108   : > { %v670_v5 = vadd.f32 %v669_v0, %v2922_v45  ;;  %v715_v6 = vadd.f32 %v714_v3, %v2922_v45 }
 0x10a   : > { %2346 = vmatmul.msk.bf16.gmra.mxu1 %vm521_vm1, %v2878_v31  ;;  %v991_v20 = vmax.f32 %v670_v5, 0.0  ;;  %v1027_v34 = vmax.f32 %v715_v6, 0.0 }
 0x10e   : > { %v3056_v17 = vpop.f32.mrf.mxu2 }
 0x10f   : > { %v671_v7 = vpop.f32.mrf.mxu0  ;;  %v716_v22 = vpop.f32.mrf.mxu1 }
 0x110   : > { %v672_v28 = vadd.f32 %v671_v7, %v2922_v45  ;;  %v717_v29 = vadd.f32 %v716_v22, %v2922_v45  ;;  %v732_v22 = vadd.f32 %v2950_v27, %v2922_v45 }
 0x112   : > { %v993_v31 = vmax.f32 %v672_v28, 0.0  ;;  %v1029_v35 = vmax.f32 %v717_v29, 0.0 }
 0x114   : > { %v1105_v46 = vpack.c.bf16 %v993_v31, %v991_v20  ;;  %v3058_v47 = vpack.c.bf16 %v1029_v35, %v1027_v34  ;;  %v1041_v31 = vmax.f32 %v732_v22, 0.0  ;;  %v742_v22 = vadd.f32 %v2987_v23, %v2922_v45 }
 0x116   : > { %1330 = vmatmul.bf16.gmra.mxu2 %v1105_v46  ;;  %v3066_v59 = vpop.f32.mrf.mxu2 }
 0x117   : > { %v674_v49 = vpop.f32.mrf.mxu0  ;;  %v719_v50 = vpop.f32.mrf.mxu1 }
 0x118   : > { %v675_v56 = vadd.f32 %v674_v49, %v2922_v45  ;;  %v720_v48 = vadd.f32 %v719_v50, %v2922_v45 }
 0x11a   : > { %2347 = vmatmul.msk.bf16.gmra.mxu1 %vm521_vm1, %v2899_v37  ;;  %v995_v0 = vmax.f32 %v675_v56, 0.0  ;;  %v1031_v5 = vmax.f32 %v720_v48, 0.0  ;;  %v730_v37 = vadd.f32 %v2944_v1, %v2922_v45  ;;  %v2542_v1 = vld [vmem:[%s3732_s5 + $0x18] sm:$0xff] }
 0x11b   : > { %1858 = vmatpush.bf16.msrb.mxu0 %v2542_v1  ;;  %2547 = vmatpush.bf16.msra.mxu3 %v2542_v1 }
 0x11c   : > { %v1039_v34 = vmax.f32 %v730_v37, 0.0  ;;  %v740_v37 = vadd.f32 %v2981_v63, %v2922_v45 }
 0x11e   : > { %v3086_v27 = vpack.c.bf16 %v1041_v31, %v1039_v34  ;;  %v1049_v34 = vmax.f32 %v742_v22, 0.0  ;;  %v750_v22 = vadd.f32 %v3015_v2, %v2922_v45 }
 0x11f   : > { %v676_v60 = vpop.f32.mrf.mxu0  ;;  %v721_v61 = vpop.f32.mrf.mxu1 }
 0x120   : > { %v677_v3 = vadd.f32 %v676_v60, %v2922_v45  ;;  %v722_v4 = vadd.f32 %v721_v61, %v2922_v45  ;;  %v1045_v61 = vmax.f32 %v737_v51, 0.0 }
 0x122   : > { %v997_v6 = vmax.f32 %v677_v3, 0.0  ;;  %v1033_v7 = vmax.f32 %v722_v4, 0.0 }
 0x124   : > { %v1107_v20 = vpack.c.bf16 %v997_v6, %v995_v0  ;;  %v3074_v28 = vpack.c.bf16 %v1033_v7, %v1031_v5  ;;  %v3107_v7 = vpop.f32.mrf.mxu3 }
 0x126   : > { %1335 = vmatmul.bf16.gmra.mxu2 %v1107_v20 }
 0x127   : > { %v803_v29 = vpop.f32.mrf.mxu1 }
 0x128   : > { %v804_v44 = vadd.f32 %v803_v29, %v3079_v43  ;;  %v1047_v29 = vmax.f32 %v740_v37, 0.0 }
 0x129   : > { %v3076_v35 = vpop.f32.mrf.mxu2 }
 0x12a   : > { %2348 = vmatmul.msk.bf16.gmra.mxu1 %vm521_vm1, %v2911_v40  ;;  %v964_v42 = vmax.f32 %v804_v44, 0.0  ;;  %v735_v40 = vadd.f32 %v2961_v36, %v2922_v45  ;;  %v3118_v1 = vpack.c.bf16 %v1049_v34, %v1047_v29  ;;  %v1055_v29 = vmax.f32 %v750_v22, 0.0 }
 0x12c   : > { %v1043_v60 = vmax.f32 %v735_v40, 0.0  ;;  %v3120_v44 = vpop.f32.mrf.mxu3  ;;  %v747_v40 = vadd.f32 %v3004_v55, %v2922_v45 }
 0x12e   : > { %v3101_v3 = vpack.c.bf16 %v1045_v61, %v1043_v60  ;;  %v1053_v61 = vmax.f32 %v747_v40, 0.0  ;;  %v757_v40 = vadd.f32 %v3043_v14, %v2922_v45 }
 0x12f   : > { %v805_v46 = vpop.f32.mrf.mxu1 }
 0x130   : > { %v806_v49 = vadd.f32 %v805_v46, %v3079_v43 }
 0x131   : > { %v3090_v50 = vpop.f32.mrf.mxu2 }
 0x132   : > { %v966_v11 = vmax.f32 %v806_v49, 0.0 }
 0x134   : > { %v1092_v56 = vpack.c.bf16 %v966_v11, %v964_v42  ;;  %v2541_v11 = vld [vmem:[%s3732_s5 + $0x10] sm:$0xff] }
 0x135   : > { %1859 = vmatpush.bf16.msrb.mxu0 %v2541_v11  ;;  %2548 = vmatpush.bf16.msra.mxu3 %v2541_v11 }
 0x136   : > { %1340 = vmatmul.bf16.gmra.mxu2 %v2934_v58  ;;  %1464 = vmatmul.bf16.vlgmr.msrb.gmra.mxu3 %v1092_v56 }
 0x137   : > { %v808_v48 = vpop.f32.mrf.mxu1 }
 0x138   : > { %v809_v4 = vadd.f32 %v808_v48, %v3079_v43  ;;  %v3134_v48 = vpop.f32.mrf.mxu3 }
 0x139   : > { %v3097_v0 = vpop.f32.mrf.mxu2 }
 0x13a   : > { %2349 = vmatmul.msk.bf16.gmra.mxu1 %vm521_vm1, %v2782_v9  ;;  %v968_v6 = vmax.f32 %v809_v4, 0.0 }
 0x13f   : > { %v810_v36 = vpop.f32.mrf.mxu1 }
 0x140   : > { %v811_v5 = vadd.f32 %v810_v36, %v3079_v43 }
 0x141   : > { %v3105_v54 = vpop.f32.mrf.mxu2 }
 0x142   : > { %v970_v58 = vmax.f32 %v811_v5, 0.0 }
 0x144   : > { %v1094_v9 = vpack.c.bf16 %v970_v58, %v968_v6 }
 0x146   : > { %1345 = vmatmul.bf16.gmra.mxu2 %v2948_v26  ;;  %1469 = vmatmul.bf16.gmra.mxu3 %v1094_v9  ;;  %v752_v9 = vadd.f32 %v3024_v33, %v2922_v45 }
 0x147   : > { %v813_v20 = vpop.f32.mrf.mxu1 }
 0x148   : > { %v814_v63 = vadd.f32 %v813_v20, %v3079_v43  ;;  %v1057_v34 = vmax.f32 %v752_v9, 0.0 }
 0x149   : > { %v3114_v31 = vpop.f32.mrf.mxu2 }
 0x14a   : > { %2350 = vmatmul.msk.bf16.gmra.mxu1 %vm521_vm1, %v2797_v12  ;;  %v972_v26 = vmax.f32 %v814_v63, 0.0  ;;  %v745_v12 = vadd.f32 %v2998_v39, %v2922_v45 }
 0x14c   : > { %v1051_v60 = vmax.f32 %v745_v12, 0.0  ;;  %v755_v12 = vadd.f32 %v3037_v24, %v2922_v45 }
 0x14e   : > { %v3140_v39 = vpack.c.bf16 %v1053_v61, %v1051_v60  ;;  %v1059_v61 = vmax.f32 %v755_v12, 0.0 }
 0x14f   : > { %v815_v46 = vpop.f32.mrf.mxu1 }
 0x150   : > { %v816_v23 = vadd.f32 %v815_v46, %v3079_v43 }
 0x151   : > { %v3124_v49 = vpop.f32.mrf.mxu2 }
 0x152   : > { %v974_v42 = vmax.f32 %v816_v23, 0.0  ;;  %v3159_v23 = vpack.c.bf16 %v1057_v34, %v1055_v29 }
 0x154   : > { %v1096_v51 = vpack.c.bf16 %v974_v42, %v972_v26 }
 0x156   : > { %1350 = vmatmul.bf16.gmra.mxu2 %v2968_v53  ;;  %1474 = vmatmul.bf16.gmra.mxu3 %v1096_v51  ;;  %v3146_v53 = vpop.f32.mrf.mxu3 }
 0x157   : > { %v818_v56 = vpop.f32.mrf.mxu1 }
 0x158   : > { %v819_v55 = vadd.f32 %v818_v56, %v3079_v43  ;;  %v2540_v56 = vld [vmem:[%s3732_s5 + $0x8] sm:$0xff] }
 0x159   : > { %v3136_v4 = vpop.f32.mrf.mxu2  ;;  %1860 = vmatpush.bf16.msrb.mxu0 %v2540_v56  ;;  %2549 = vmatpush.bf16.msra.mxu3 %v2540_v56 }
 0x15a   : > { %2351 = vmatmul.msk.bf16.gmra.mxu1 %vm521_vm1, %v2812_v15  ;;  %v976_v58 = vmax.f32 %v819_v55, 0.0  ;;  %v1061_v55 = vmax.f32 %v757_v40, 0.0 }
 0x15c   : > { %v3179_v24 = vpack.c.bf16 %v1061_v55, %v1059_v61  ;;  %v2539_v61 = vld [vmem:[%s3732_s5] sm:$0xff] }
 0x15d   : > { %1861 = vmatpush.bf16.msrb.mxu0 %v2539_v61  ;;  %2550 = vmatpush.bf16.msra.mxu3 %v2539_v61 }
 0x15e   : > { %v3157_v46 = vpop.f32.mrf.mxu3 }
 0x15f   : > { %v820_v36 = vpop.f32.mrf.mxu1 }
 0x160   : > { %v821_v5 = vadd.f32 %v820_v36, %v3079_v43 }
 0x161   : > { %v3144_v6 = vpop.f32.mrf.mxu2 }
 0x162   : > { %v978_v37 = vmax.f32 %v821_v5, 0.0 }
 0x164   : > { %v1098_v15 = vpack.c.bf16 %v978_v37, %v976_v58 }
 0x166   : > { %1355 = vmatmul.bf16.gmra.mxu2 %v2985_v8  ;;  %1479 = vmatmul.bf16.gmra.mxu3 %v1098_v15  ;;  %v3169_v51 = vpop.f32.mrf.mxu3  ;;  %v760_v15 = vadd.f32 %v3056_v17, %v2922_v45 }
 0x167   : > { %v823_v20 = vpop.f32.mrf.mxu1 }
 0x168   : > { %v824_v2 = vadd.f32 %v823_v20, %v3079_v43  ;;  %v762_v20 = vadd.f32 %v3066_v59, %v2922_v45  ;;  %v1063_v34 = vmax.f32 %v760_v15, 0.0 }
 0x169   : > { %v3153_v63 = vpop.f32.mrf.mxu2 }
 0x16a   : > { %2352 = vmatmul.msk.bf16.gmra.mxu1 %vm521_vm1, %v2827_v18  ;;  %v980_v8 = vmax.f32 %v824_v2, 0.0  ;;  %v1065_v2 = vmax.f32 %v762_v20, 0.0 }
 0x16e   : > { %v3182_v5 = vpop.f32.mrf.mxu3 }
 0x16f   : > { %v825_v26 = vpop.f32.mrf.mxu1 }
 0x170   : > { %v826_v33 = vadd.f32 %v825_v26, %v3079_v43 }
 0x171   : > { %v3163_v42 = vpop.f32.mrf.mxu2 }
 0x172   : > { %v982_v11 = vmax.f32 %v826_v33, 0.0 }
 0x174   : > { %v1100_v18 = vpack.c.bf16 %v982_v11, %v980_v8  ;;  %v3198_v8 = vpack.c.bf16 %v1065_v2, %v1063_v34 }
 0x176   : > { %1360 = vmatmul.bf16.gmra.mxu2 %v3002_v52  ;;  %1484 = vmatmul.bf16.gmra.mxu3 %v1100_v18  ;;  %v3192_v26 = vpop.f32.mrf.mxu3 }
 0x177   : > { %v828_v60 = vpop.f32.mrf.mxu1 }
 0x178   : > { %v829_v14 = vadd.f32 %v828_v60, %v3079_v43 }
 0x179   : > { %v3175_v36 = vpop.f32.mrf.mxu2 }
 0x17a   : > { %2353 = vmatmul.msk.bf16.gmra.mxu1 %vm521_vm1, %v2842_v21  ;;  %v984_v22 = vmax.f32 %v829_v14, 0.0 }
 0x17e   : > { %v3204_v18 = vpop.f32.mrf.mxu3 }
 0x17f   : > { %v830_v52 = vpop.f32.mrf.mxu1 }
 0x180   : > { %v831_v58 = vadd.f32 %v830_v52, %v3079_v43 }
 0x181   : > { %v3185_v37 = vpop.f32.mrf.mxu2 }
 0x182   : > { %v986_v9 = vmax.f32 %v831_v58, 0.0 }
 0x184   : > { %v1102_v21 = vpack.c.bf16 %v986_v9, %v984_v22 }
 0x186   : > { %1365 = vmatmul.bf16.gmra.mxu2 %v3022_v30  ;;  %1489 = vmatmul.bf16.gmra.mxu3 %v1102_v21  ;;  %v3214_v55 = vpop.f32.mrf.mxu3 }
 0x187   : > { %v833_v29 = vpop.f32.mrf.mxu1 }
 0x188   : > { %v834_v17 = vadd.f32 %v833_v29, %v3079_v43 }
 0x189   : > { %v3194_v33 = vpop.f32.mrf.mxu2 }
 0x18a   : > { %2354 = vmatmul.msk.bf16.gmra.mxu1 %vm521_vm1, %v2857_v25  ;;  %v988_v12 = vmax.f32 %v834_v17, 0.0 }
 0x18f   : > { %v835_v11 = vpop.f32.mrf.mxu1 }
 0x190   : > { %v836_v59 = vadd.f32 %v835_v11, %v3079_v43 }
 0x191   : > { %v3202_v40 = vpop.f32.mrf.mxu2 }
 0x192   : > { %v990_v30 = vmax.f32 %v836_v59, 0.0 }
 0x194   : > { %v1104_v56 = vpack.c.bf16 %v990_v30, %v988_v12 }
 0x196   : > { %1370 = vmatmul.bf16.gmra.mxu2 %v3039_v62  ;;  %1494 = vmatmul.bf16.gmra.mxu3 %v1104_v56 }
 0x197   : > { %v838_v60 = vpop.f32.mrf.mxu1 }
 0x198   : > { %v839_v14 = vadd.f32 %v838_v60, %v3079_v43 }
 0x199   : > { %v3209_v25 = vpop.f32.mrf.mxu2 }
 0x19a   : > { %2355 = vmatmul.msk.bf16.gmra.mxu1 %vm521_vm1, %v2881_v32  ;;  %v992_v58 = vmax.f32 %v839_v14, 0.0  ;;  %v3221_v32 = vpop.f32.mrf.mxu3 }
 0x19f   : > { %v840_v52 = vpop.f32.mrf.mxu1 }
 0x1a0   : > { %v841_v62 = vadd.f32 %v840_v52, %v3079_v43 }
 0x1a1   : > { %v3218_v15 = vpop.f32.mrf.mxu2 }
 0x1a2   : > { %v994_v22 = vmax.f32 %v841_v62, 0.0  ;;  %v3229_v17 = vpop.f32.mrf.mxu3 }
 0x1a4   : > { %v1106_v9 = vpack.c.bf16 %v994_v22, %v992_v58 }
 0x1a6   : > { %1375 = vmatmul.bf16.gmra.mxu2 %v3058_v47  ;;  %1499 = vmatmul.bf16.gmra.mxu3 %v1106_v9 }
 0x1a7   : > { %v843_v20 = vpop.f32.mrf.mxu1 }
 0x1a8   : > { %v844_v21 = vadd.f32 %v843_v20, %v3079_v43 }
 0x1a9   : > { %v3226_v34 = vpop.f32.mrf.mxu2 }
 0x1aa   : > { %2356 = vmatmul.msk.bf16.gmra.mxu1 %vm521_vm1, %v2902_v38  ;;  %v996_v11 = vmax.f32 %v844_v21, 0.0  ;;  %v3235_v38 = vld [vmem:[%s3731_s4] ss:$0 sm:$0xff] }
 0x1ab   : > { %v1297_v60 = vadd.f32 %v3235_v38, %v3076_v35 }
 0x1af   : > { %v845_v29 = vpop.f32.mrf.mxu1 }
 0x1b0   : > { %v846_v2 = vadd.f32 %v845_v29, %v3079_v43 }
 0x1b1   : > { %v3237_v56 = vpop.f32.mrf.mxu2 }
 0x1b2   : > { %v998_v59 = vmax.f32 %v846_v2, 0.0 }
 0x1b4   : > { %v1108_v12 = vpack.c.bf16 %v998_v59, %v996_v11  ;;  %v1302_v59 = vadd.f32 %v3235_v38, %v3097_v0 }
 0x1b6   : > { %1380 = vmatmul.bf16.gmra.mxu2 %v3074_v28  ;;  %1504 = vmatmul.bf16.gmra.mxu3 %v1108_v12  ;;  %v1299_v28 = vadd.f32 %v3235_v38, %v3090_v50 }
 0x1b7   : > { %v848_v47 = vpop.f32.mrf.mxu1 }
 0x1b8   : > { %v849_v61 = vadd.f32 %v848_v47, %v3079_v43 }
 0x1b9   : > { %v1465_v30 = vpop.f32.mrf.mxu3  ;;  %v3247_v21 = vpop.f32.mrf.mxu2 }
 0x1ba   : > { %2357 = vmatmul.msk.bf16.gmra.mxu1 %vm521_vm1, %v2914_v41  ;;  %v1466_v52 = vadd.f32 %v1465_v30, %v1297_v60  ;;  %v1000_v22 = vmax.f32 %v849_v61, 0.0  ;;  %v1304_v60 = vadd.f32 %v3235_v38, %v3105_v54 }
 0x1bc   : > { %v1625_v29 = vmax.f32 %v1466_v52, 0.0 }
 0x1bf   : > { %v850_v14 = vpop.f32.mrf.mxu1 }
 0x1c0   : > { %v851_v62 = vadd.f32 %v850_v14, %v3079_v43 }
 0x1c1   : > { %v1467_v58 = vpop.f32.mrf.mxu3  ;;  %v3255_v12 = vpop.f32.mrf.mxu2 }
 0x1c2   : > { %v1002_v9 = vmax.f32 %v851_v62, 0.0  ;;  %v1468_v20 = vadd.f32 %v1467_v58, %v1299_v28 }
 0x1c4   : > { %v1626_v41 = vmax.f32 %v1468_v20, 0.0  ;;  %v1110_v2 = vpack.c.bf16 %v1002_v9, %v1000_v22 }
 0x1c6   : > { %v1689_v35 = vpack.c.bf16 %v1626_v41, %v1625_v29  ;;  %1385 = vmatmul.bf16.gmra.mxu2 %v3063_v57  ;;  %1509 = vmatmul.bf16.gmra.mxu3 %v1110_v2  ;;  %v1307_v29 = vadd.f32 %v3235_v38, %v3114_v31 }
 0x1c7   : > { %v853_v11 = vpop.f32.mrf.mxu1 }
 0x1c8   : > { %2452 = vmatmul.msk.bf16.vlgmr.msrb.gmra.mxu0 %vm1757_vm2, %v1689_v35  ;;  %v854_v47 = vadd.f32 %v853_v11, %v3079_v43 }
 0x1c9   : > { %v1470_v50 = vpop.f32.mrf.mxu3  ;;  %v3262_v20 = vpop.f32.mrf.mxu2 }
 0x1ca   : > { %2358 = vmatmul.msk.bf16.gmra.mxu1 %vm521_vm1, %v2785_v10  ;;  %v1471_v57 = vadd.f32 %v1470_v50, %v1302_v59  ;;  %v1004_v28 = vmax.f32 %v854_v47, 0.0 }
 0x1cc   : > { %v1627_v58 = vmax.f32 %v1471_v57, 0.0 }
 0x1cf   : > { %v855_v30 = vpop.f32.mrf.mxu1 }
 0x1d0   : > { %v856_v61 = vadd.f32 %v855_v30, %v3079_v43 }
 0x1d1   : > { %v1472_v14 = vpop.f32.mrf.mxu3  ;;  %v3273_v59 = vpop.f32.mrf.mxu2 }
 0x1d2   : > { %v1006_v52 = vmax.f32 %v856_v61, 0.0  ;;  %v1473_v62 = vadd.f32 %v1472_v14, %v1304_v60 }
 0x1d4   : > { %v1628_v10 = vmax.f32 %v1473_v62, 0.0  ;;  %v1112_v22 = vpack.c.bf16 %v1006_v52, %v1004_v28  ;;  %v1312_v52 = vadd.f32 %v3235_v38, %v3136_v4 }
 0x1d6   : > { %1390 = vmatmul.bf16.gmra.mxu2 %v3086_v27  ;;  %1514 = vmatmul.bf16.gmra.mxu3 %v1112_v22  ;;  %v1690_v0 = vpack.c.bf16 %v1628_v10, %v1627_v58  ;;  %v1309_v27 = vadd.f32 %v3235_v38, %v3124_v49 }
 0x1d7   : > { %v858_v9 = vpop.f32.mrf.mxu1 }
 0x1d8   : > { %2453 = vmatmul.msk.bf16.gmra.mxu0 %vm1757_vm2, %v1690_v0  ;;  %v859_v41 = vadd.f32 %v858_v9, %v3079_v43 }
 0x1d9   : > { %v1475_v54 = vpop.f32.mrf.mxu3  ;;  %v3279_v28 = vpop.f32.mrf.mxu2 }
 0x1da   : > { %2359 = vmatmul.msk.bf16.gmra.mxu1 %vm521_vm1, %v2800_v13  ;;  %v1476_v35 = vadd.f32 %v1475_v54, %v1307_v29  ;;  %v1008_v47 = vmax.f32 %v859_v41, 0.0 }
 0x1dc   : > { %v1629_v57 = vmax.f32 %v1476_v35, 0.0 }
 0x1df   : > { %v860_v2 = vpop.f32.mrf.mxu1 }
 0x1e0   : > { %v861_v11 = vadd.f32 %v860_v2, %v3079_v43 }
 0x1e1   : > { %v1477_v50 = vpop.f32.mrf.mxu3 }
 0x1e2   : > { %v1010_v30 = vmax.f32 %v861_v11, 0.0  ;;  %v1478_v60 = vadd.f32 %v1477_v50, %v1309_v27  ;;  %v3287_v27 = vpop.f32.mrf.mxu2  ;;  %v1317_v11 = vadd.f32 %v3235_v38, %v3153_v63 }
 0x1e4   : > { %v1630_v13 = vmax.f32 %v1478_v60, 0.0  ;;  %v1114_v61 = vpack.c.bf16 %v1010_v30, %v1008_v47  ;;  %v1319_v30 = vadd.f32 %v3235_v38, %v3163_v42 }
 0x1e6   : > { %1395 = vmatmul.bf16.gmra.mxu2 %v3101_v3  ;;  %1519 = vmatmul.bf16.gmra.mxu3 %v1114_v61  ;;  %v1691_v31 = vpack.c.bf16 %v1630_v13, %v1629_v57  ;;  %v1314_v3 = vadd.f32 %v3235_v38, %v3144_v6 }
 0x1e7   : > { %v863_v14 = vpop.f32.mrf.mxu1 }
 0x1e8   : > { %2454 = vmatmul.msk.bf16.gmra.mxu0 %vm1757_vm2, %v1691_v31  ;;  %v864_v62 = vadd.f32 %v863_v14, %v3079_v43 }
 0x1e9   : > { %v1480_v49 = vpop.f32.mrf.mxu3 }
 0x1ea   : > { %2360 = vmatmul.msk.bf16.gmra.mxu1 %vm521_vm1, %v2815_v16  ;;  %v1481_v10 = vadd.f32 %v1480_v49, %v1312_v52  ;;  %v1012_v9 = vmax.f32 %v864_v62, 0.0  ;;  %v3298_v60 = vpop.f32.mrf.mxu2 }
 0x1ec   : > { %v1631_v41 = vmax.f32 %v1481_v10, 0.0  ;;  %v1322_v10 = vadd.f32 %v3235_v38, %v3175_v36 }
 0x1ef   : > { %v865_v58 = vpop.f32.mrf.mxu1 }
 0x1f0   : > { %v866_v22 = vadd.f32 %v865_v58, %v3079_v43 }
 0x1f1   : > { %v1482_v0 = vpop.f32.mrf.mxu3 }
 0x1f2   : > { %v1014_v54 = vmax.f32 %v866_v22, 0.0  ;;  %v1483_v29 = vadd.f32 %v1482_v0, %v1314_v3  ;;  %v3303_v58 = vpop.f32.mrf.mxu2  ;;  %v2594_v3 = vld [vmem:[%s2776_s8 + $0xb0] sm:$0xff] }
 0x1f4   : > { %v1632_v16 = vmax.f32 %v1483_v29, 0.0  ;;  %v1116_v2 = vpack.c.bf16 %v1014_v54, %v1012_v9  ;;  %v1324_v9 = vadd.f32 %v3235_v38, %v3185_v37 }
 0x1f6   : > { %v1692_v35 = vpack.c.bf16 %v1632_v16, %v1631_v41  ;;  %1400 = vmatmul.bf16.gmra.mxu2 %v3118_v1  ;;  %1524 = vmatmul.bf16.gmra.mxu3 %v1116_v2 }
 0x1f7   : > { %v868_v4 = vpop.f32.mrf.mxu1 }
 0x1f8   : > { %2455 = vmatmul.msk.bf16.gmra.mxu0 %vm1757_vm2, %v1692_v35  ;;  %v869_v50 = vadd.f32 %v868_v4, %v3079_v43 }
 0x1f9   : > { %v1485_v6 = vpop.f32.mrf.mxu3 }
 0x1fa   : > { %2361 = vmatmul.msk.bf16.gmra.mxu1 %vm521_vm1, %v2830_v19  ;;  %v1486_v1 = vadd.f32 %v1485_v6, %v1317_v11  ;;  %v1016_v61 = vmax.f32 %v869_v50, 0.0  ;;  %v3313_v35 = vpop.f32.mrf.mxu2 }
 0x1fc   : > { %v1633_v19 = vmax.f32 %v1486_v1, 0.0 }
 0x1ff   : > { %v870_v47 = vpop.f32.mrf.mxu1 }
 0x200   : > { %v871_v57 = vadd.f32 %v870_v47, %v3079_v43  ;;  %v2595_v47 = vld [vmem:[%s2776_s8 + $0xb8] sm:$0xff] }
 0x201   : > { %v1487_v13 = vpop.f32.mrf.mxu3 }
 0x202   : > { %v1018_v31 = vmax.f32 %v871_v57, 0.0  ;;  %v1488_v14 = vadd.f32 %v1487_v13, %v1319_v30  ;;  %v1327_v30 = vadd.f32 %v3235_v38, %v3194_v33  ;;  %v3321_v1 = vpop.f32.mrf.mxu2 }
 0x204   : > { %v1634_v49 = vmax.f32 %v1488_v14, 0.0  ;;  %v1118_v52 = vpack.c.bf16 %v1018_v31, %v1016_v61  ;;  %v1329_v61 = vadd.f32 %v3235_v38, %v3202_v40 }
 0x206   : > { %v1693_v63 = vpack.c.bf16 %v1634_v49, %v1633_v19  ;;  %1405 = vmatmul.bf16.gmra.mxu2 %v3140_v39  ;;  %1529 = vmatmul.bf16.gmra.mxu3 %v1118_v52 }
 0x207   : > { %v873_v62 = vpop.f32.mrf.mxu1 }
 0x208   : > { %2456 = vmatmul.msk.bf16.gmra.mxu0 %vm1757_vm2, %v1693_v63  ;;  %v874_v22 = vadd.f32 %v873_v62, %v3079_v43 }
 0x209   : > { %v1490_v42 = vpop.f32.mrf.mxu3 }
 0x20a   : > { %2362 = vmatmul.msk.bf16.gmra.mxu1 %vm521_vm1, %v2594_v3  ;;  %v1491_v39 = vadd.f32 %v1490_v42, %v1322_v10  ;;  %v1020_v41 = vmax.f32 %v874_v22, 0.0  ;;  %v3328_v10 = vpop.f32.mrf.mxu2  ;;  %v2596_v22 = vld [vmem:[%s2776_s8 + $0xc0] sm:$0xff] }
 0x20c   : > { %v1635_v4 = vmax.f32 %v1491_v39, 0.0 }
 0x20f   : > { %v875_v0 = vpop.f32.mrf.mxu1 }
 0x210   : > { %v876_v54 = vadd.f32 %v875_v0, %v3079_v43  ;;  %v1332_v0 = vadd.f32 %v3235_v38, %v3209_v25 }
 0x211   : > { %v1492_v29 = vpop.f32.mrf.mxu3 }
 0x212   : > { %v1022_v16 = vmax.f32 %v876_v54, 0.0  ;;  %v1493_v2 = vadd.f32 %v1492_v29, %v1324_v9  ;;  %v1334_v54 = vadd.f32 %v3235_v38, %v3218_v15 }
 0x214   : > { %v1636_v6 = vmax.f32 %v1493_v2, 0.0  ;;  %v1120_v11 = vpack.c.bf16 %v1022_v16, %v1020_v41  ;;  %v3339_v16 = vpop.f32.mrf.mxu2 }
 0x216   : > { %v1694_v36 = vpack.c.bf16 %v1636_v6, %v1635_v4  ;;  %1410 = vmatmul.bf16.gmra.mxu2 %v3159_v23  ;;  %1534 = vmatmul.bf16.gmra.mxu3 %v1120_v11 }
 0x217   : > { %v878_v50 = vpop.f32.mrf.mxu1 }
 0x218   : > { %2457 = vmatmul.msk.bf16.gmra.mxu0 %vm1757_vm2, %v1694_v36  ;;  %v879_v57 = vadd.f32 %v878_v50, %v3079_v43 }
 0x219   : > { %v1495_v37 = vpop.f32.mrf.mxu3 }
 0x21a   : > { %2363 = vmatmul.msk.bf16.gmra.mxu1 %vm521_vm1, %v2595_v47  ;;  %v1496_v23 = vadd.f32 %v1495_v37, %v1327_v30  ;;  %v1024_v19 = vmax.f32 %v879_v57, 0.0  ;;  %v2597_v47 = vld [vmem:[%s2776_s8 + $0xc8] sm:$0xff]  ;;  %v765_v30 = vadd.f32 %v3107_v7, %v2922_v45  ;;  %v767_v57 = vadd.f32 %v3120_v44, %v2922_v45 }
 0x21c   : > { %v1637_v63 = vmax.f32 %v1496_v23, 0.0  ;;  %v1067_v23 = vmax.f32 %v765_v30, 0.0 }
 0x21f   : > { %v880_v13 = vpop.f32.mrf.mxu1 }
 0x220   : > { %v881_v31 = vadd.f32 %v880_v13, %v3079_v43  ;;  %v3349_v13 = vpop.f32.mrf.mxu2 }
 0x221   : > { %v1497_v14 = vpop.f32.mrf.mxu3 }
 0x222   : > { %v1026_v49 = vmax.f32 %v881_v31, 0.0  ;;  %v1498_v52 = vadd.f32 %v1497_v14, %v1329_v61  ;;  %v1069_v14 = vmax.f32 %v767_v57, 0.0 }
 0x224   : > { %v1638_v62 = vmax.f32 %v1498_v52, 0.0  ;;  %v1122_v42 = vpack.c.bf16 %v1026_v49, %v1024_v19  ;;  %v1339_v19 = vadd.f32 %v3235_v38, %v3237_v56 }
 0x226   : > { %v1695_v33 = vpack.c.bf16 %v1638_v62, %v1637_v63  ;;  %1415 = vmatmul.bf16.gmra.mxu2 %v3179_v24  ;;  %1539 = vmatmul.bf16.gmra.mxu3 %v1122_v42 }
 0x227   : > { %v883_v3 = vpop.f32.mrf.mxu1 }
 0x228   : > { %2458 = vmatmul.msk.bf16.gmra.mxu0 %vm1757_vm2, %v1695_v33  ;;  %v884_v9 = vadd.f32 %v883_v3, %v3079_v43  ;;  %v1143_v3 = vpack.c.bf16 %v1069_v14, %v1067_v23 }
 0x229   : > { %v1500_v40 = vpop.f32.mrf.mxu3 }
 0x22a   : > { %2364 = vmatmul.msk.bf16.gmra.mxu1 %vm521_vm1, %v2596_v22  ;;  %v1501_v24 = vadd.f32 %v1500_v40, %v1332_v0  ;;  %v1028_v2 = vmax.f32 %v884_v9, 0.0  ;;  %v3365_v22 = vpop.f32.mrf.mxu2 }
 0x22c   : > { %v1639_v11 = vmax.f32 %v1501_v24, 0.0  ;;  %v2598_v24 = vld [vmem:[%s2776_s8 + $0xd0] sm:$0xff] }
 0x22f   : > { %v885_v39 = vpop.f32.mrf.mxu1 }
 0x230   : > { %v886_v29 = vadd.f32 %v885_v39, %v3079_v43 }
 0x231   : > { %v1502_v41 = vpop.f32.mrf.mxu3 }
 0x232   : > { %v1030_v4 = vmax.f32 %v886_v29, 0.0  ;;  %v1503_v6 = vadd.f32 %v1502_v41, %v1334_v54  ;;  %v770_v29 = vadd.f32 %v3134_v48, %v2922_v45  ;;  %v772_v41 = vadd.f32 %v3146_v53, %v2922_v45 }
 0x234   : > { %v1640_v36 = vmax.f32 %v1503_v6, 0.0  ;;  %v1124_v50 = vpack.c.bf16 %v1030_v4, %v1028_v2  ;;  %v1342_v4 = vadd.f32 %v3235_v38, %v3247_v21 }
 0x236   : > { %v1696_v25 = vpack.c.bf16 %v1640_v36, %v1639_v11  ;;  %1420 = vmatmul.bf16.gmra.mxu2 %v3198_v8  ;;  %1544 = vmatmul.bf16.gmra.mxu3 %v1124_v50  ;;  %v1337_v8 = vadd.f32 %v3235_v38, %v3226_v34  ;;  %v3363_v34 = vld [vmem:[%s3733_s6] ss:$0 sm:$0xff]  ;;  %v1071_v36 = vmax.f32 %v770_v29, 0.0 }
 0x237   : > { %v888_v37 = vpop.f32.mrf.mxu1 }
 0x238   : > { %2459 = vmatmul.msk.bf16.gmra.mxu0 %vm1757_vm2, %v1696_v25  ;;  %v889_v61 = vadd.f32 %v888_v37, %v3079_v43  ;;  %v1073_v25 = vmax.f32 %v772_v41, 0.0  ;;  %v1344_v37 = vadd.f32 %v3235_v38, %v3255_v12 }
 0x239   : > { %v1505_v15 = vpop.f32.mrf.mxu3 }
 0x23a   : > { %2365 = vmatmul.msk.bf16.gmra.mxu1 %vm521_vm1, %v2597_v47  ;;  %v1506_v49 = vadd.f32 %v1505_v15, %v1337_v8  ;;  %v1032_v63 = vmax.f32 %v889_v61, 0.0  ;;  %v3384_v15 = vpop.f32.mrf.mxu2  ;;  %v1145_v23 = vpack.c.bf16 %v1073_v25, %v1071_v36 }
 0x23c   : > { %v1641_v42 = vmax.f32 %v1506_v49, 0.0 }
 0x23f   : > { %v890_v31 = vpop.f32.mrf.mxu1 }
 0x240   : > { %v891_v7 = vadd.f32 %v890_v31, %v3079_v43 }
 0x241   : > { %v1507_v52 = vpop.f32.mrf.mxu3 }
 0x242   : > { %v1034_v44 = vmax.f32 %v891_v7, 0.0  ;;  %v1508_v62 = vadd.f32 %v1507_v52, %v1339_v19  ;;  %v3391_v52 = vpop.f32.mrf.mxu2 }
 0x244   : > { %v1642_v33 = vmax.f32 %v1508_v62, 0.0  ;;  %v1126_v40 = vpack.c.bf16 %v1034_v44, %v1032_v63  ;;  %v2599_v63 = vld [vmem:[%s2776_s8 + $0xd8] sm:$0xff]  ;;  %v775_v44 = vadd.f32 %v3157_v46, %v2922_v45  ;;  %v777_v62 = vadd.f32 %v3169_v51, %v2922_v45 }
 0x245   : > { %v1863_v56 = vpop.f32.mrf.mxu0 }
 0x246   : > { %v1697_v0 = vpack.c.bf16 %v1642_v33, %v1641_v42  ;;  %v1864_v9 = vadd.f32 %v3363_v34, %v1863_v56  ;;  %1425 = vmatmul.bf16.gmra.mxu2 %v1143_v3  ;;  %1549 = vmatmul.bf16.gmra.mxu3 %v1126_v40  ;;  %v1347_v33 = vadd.f32 %v3235_v38, %v3262_v20  ;;  %v1075_v56 = vmax.f32 %v775_v44, 0.0 }
 0x247   : > { %v893_v39 = vpop.f32.mrf.mxu1 }
 0x248   : > { %2023 = vst [vmem:[%s3368_s21] sm:$0xff] %v1864_v9  ;;  %2460 = vmatmul.msk.bf16.gmra.mxu0 %vm1757_vm2, %v1697_v0  ;;  %v894_v6 = vadd.f32 %v893_v39, %v3079_v43  ;;  %v1077_v9 = vmax.f32 %v777_v62, 0.0  ;;  %v1349_v39 = vadd.f32 %v3235_v38, %v3273_v59 }
 0x249   : > { %v1510_v54 = vpop.f32.mrf.mxu3 }
 0x24a   : > { %2366 = vmatmul.msk.bf16.gmra.mxu1 %vm521_vm1, %v2598_v24  ;;  %v1511_v48 = vadd.f32 %v1510_v54, %v1342_v4  ;;  %v1036_v30 = vmax.f32 %v894_v6, 0.0  ;;  %v3407_v41 = vpop.f32.mrf.mxu2  ;;  %v1147_v6 = vpack.c.bf16 %v1077_v9, %v1075_v56  ;;  %v2601_v9 = vld [vmem:[%s2776_s8 + $0xe8] sm:$0xff] }
 0x24c   : > { %v1643_v8 = vmax.f32 %v1511_v48, 0.0  ;;  %v2600_v48 = vld [vmem:[%s2776_s8 + $0xe0] sm:$0xff] }
 0x24d   : > { %v1865_v2 = vpop.f32.mrf.mxu0 }
 0x24e   : > { %v1866_v11 = vadd.f32 %v3363_v34, %v1865_v2 }
 0x24f   : > { %v895_v50 = vpop.f32.mrf.mxu1 }
 0x250   : > { %2024 = vst [vmem:[%s3368_s21 + $0x8] sm:$0xff] %v1866_v11  ;;  %v896_v53 = vadd.f32 %v895_v50, %v3079_v43 }
 0x251   : > { %v1512_v47 = vpop.f32.mrf.mxu3 }
 0x252   : > { %v1038_v21 = vmax.f32 %v896_v53, 0.0  ;;  %v1513_v57 = vadd.f32 %v1512_v47, %v1344_v37  ;;  %v780_v53 = vadd.f32 %v3182_v5, %v2922_v45  ;;  %v782_v47 = vadd.f32 %v3192_v26, %v2922_v45 }
 0x254   : > { %v1644_v61 = vmax.f32 %v1513_v57, 0.0  ;;  %v1128_v31 = vpack.c.bf16 %v1038_v21, %v1036_v30  ;;  %v1352_v21 = vadd.f32 %v3235_v38, %v3279_v28  ;;  %v3420_v57 = vpop.f32.mrf.mxu2 }
 0x255   : > { %v1868_v14 = vpop.f32.mrf.mxu0 }
 0x256   : > { %v1698_v19 = vpack.c.bf16 %v1644_v61, %v1643_v8  ;;  %v1869_v12 = vadd.f32 %v3363_v34, %v1868_v14  ;;  %1430 = vmatmul.bf16.gmra.mxu2 %v1145_v23  ;;  %1554 = vmatmul.bf16.gmra.mxu3 %v1128_v31  ;;  %v1079_v23 = vmax.f32 %v780_v53, 0.0  ;;  %v1081_v14 = vmax.f32 %v782_v47, 0.0 }
 0x257   : > { %v898_v49 = vpop.f32.mrf.mxu1 }
 0x258   : > { %2025 = vst [vmem:[%s3368_s21 + $0x10] sm:$0xff] %v1869_v12  ;;  %2461 = vmatmul.msk.bf16.gmra.mxu0 %vm1757_vm2, %v1698_v19  ;;  %v899_v3 = vadd.f32 %v898_v49, %v3079_v43  ;;  %v1354_v19 = vadd.f32 %v3235_v38, %v3287_v27 }
 0x259   : > { %v1515_v7 = vpop.f32.mrf.mxu3 }
 0x25a   : > { %2367 = vmatmul.msk.bf16.gmra.mxu1 %vm521_vm1, %v2599_v63  ;;  %v1516_v54 = vadd.f32 %v1515_v7, %v1347_v33  ;;  %v1040_v24 = vmax.f32 %v899_v3, 0.0 }
 0x25c   : > { %v1645_v2 = vmax.f32 %v1516_v54, 0.0  ;;  %v3429_v56 = vpop.f32.mrf.mxu2  ;;  %v787_v54 = vadd.f32 %v3214_v55, %v2922_v45 }
 0x25d   : > { %v1870_v42 = vpop.f32.mrf.mxu0 }
 0x25e   : > { %v1871_v40 = vadd.f32 %v3363_v34, %v1870_v42  ;;  %v1149_v42 = vpack.c.bf16 %v1081_v14, %v1079_v23  ;;  %v790_v23 = vadd.f32 %v3221_v32, %v2922_v45 }
 0x25f   : > { %v900_v0 = vpop.f32.mrf.mxu1 }
 0x260   : > { %2026 = vst [vmem:[%s3368_s21 + $0x18] sm:$0xff] %v1871_v40  ;;  %v901_v46 = vadd.f32 %v900_v0, %v3079_v43 }
 0x261   : > { %v1517_v51 = vpop.f32.mrf.mxu3 }
 0x262   : > { %v1042_v29 = vmax.f32 %v901_v46, 0.0  ;;  %v1518_v20 = vadd.f32 %v1517_v51, %v1349_v39  ;;  %v785_v39 = vadd.f32 %v3204_v18, %v2922_v45  ;;  %v1357_v51 = vadd.f32 %v3235_v38, %v3298_v60 }
 0x264   : > { %v1646_v4 = vmax.f32 %v1518_v20, 0.0  ;;  %v1130_v11 = vpack.c.bf16 %v1042_v29, %v1040_v24  ;;  %v1083_v20 = vmax.f32 %v785_v39, 0.0 }
 0x265   : > { %v1873_v36 = vpop.f32.mrf.mxu0 }
 0x266   : > { %v1699_v50 = vpack.c.bf16 %v1646_v4, %v1645_v2  ;;  %v1874_v59 = vadd.f32 %v3363_v34, %v1873_v36  ;;  %1435 = vmatmul.bf16.gmra.mxu2 %v1147_v6  ;;  %1559 = vmatmul.bf16.gmra.mxu3 %v1130_v11  ;;  %v1085_v4 = vmax.f32 %v787_v54, 0.0  ;;  %v1359_v6 = vadd.f32 %v3235_v38, %v3303_v58  ;;  %v3447_v36 = vpop.f32.mrf.mxu2 }
 0x267   : > { %v903_v25 = vpop.f32.mrf.mxu1 }
 0x268   : > { %2027 = vst [vmem:[%s3368_s21 + $0x20] sm:$0xff] %v1874_v59  ;;  %2462 = vmatmul.msk.bf16.gmra.mxu0 %vm1757_vm2, %v1699_v50  ;;  %v904_v8 = vadd.f32 %v903_v25, %v3079_v43  ;;  %v1151_v53 = vpack.c.bf16 %v1085_v4, %v1083_v20  ;;  %v1369_v4 = vadd.f32 %v3235_v38, %v3339_v16 }
 0x269   : > { %v1520_v37 = vpop.f32.mrf.mxu3 }
 0x26a   : > { %2368 = vmatmul.msk.bf16.gmra.mxu1 %vm521_vm1, %v2600_v48  ;;  %v1521_v5 = vadd.f32 %v1520_v37, %v1352_v21  ;;  %v1044_v49 = vmax.f32 %v904_v8, 0.0 }
 0x26c   : > { %v1647_v63 = vmax.f32 %v1521_v5, 0.0  ;;  %v1362_v5 = vadd.f32 %v3235_v38, %v3313_v35 }
 0x26d   : > { %v1875_v30 = vpop.f32.mrf.mxu0 }
 0x26e   : > { %v1876_v61 = vadd.f32 %v3363_v34, %v1875_v30  ;;  %v3458_v14 = vpop.f32.mrf.mxu2 }
 0x26f   : > { %v905_v31 = vpop.f32.mrf.mxu1 }
 0x270   : > { %2028 = vst [vmem:[%s3368_s21 + $0x28] sm:$0xff] %v1876_v61  ;;  %v906_v26 = vadd.f32 %v905_v31, %v3079_v43  ;;  %v2602_v61 = vld [vmem:[%s2776_s8 + $0xf0] sm:$0xff]  ;;  %v792_v31 = vadd.f32 %v3229_v17, %v2922_v45 }
 0x271   : > { %v1522_v12 = vpop.f32.mrf.mxu3 }
 0x272   : > { %v1046_v28 = vmax.f32 %v906_v26, 0.0  ;;  %v1523_v7 = vadd.f32 %v1522_v12, %v1354_v19 }
 0x274   : > { %v1132_v44 = vpack.c.bf16 %v1046_v28, %v1044_v49  ;;  %v1648_v62 = vmax.f32 %v1523_v7, 0.0  ;;  %v1087_v49 = vmax.f32 %v790_v23, 0.0  ;;  %v1089_v7 = vmax.f32 %v792_v31, 0.0 }
 0x275   : > { %v1878_v33 = vpop.f32.mrf.mxu0  ;;  %v1374_v23 = vadd.f32 %v3235_v38, %v3365_v22 }
 0x276   : > { %v1700_v3 = vpack.c.bf16 %v1648_v62, %v1647_v63  ;;  %v1879_v40 = vadd.f32 %v3363_v34, %v1878_v33  ;;  %1440 = vmatmul.bf16.gmra.mxu2 %v1149_v42  ;;  %1564 = vmatmul.bf16.gmra.mxu3 %v1132_v44  ;;  %v1364_v63 = vadd.f32 %v3235_v38, %v3321_v1 }
 0x277   : > { %v908_v27 = vpop.f32.mrf.mxu1 }
 0x278   : > { %2029 = vst [vmem:[%s3368_s21 + $0x30] sm:$0xff] %v1879_v40  ;;  %2463 = vmatmul.msk.bf16.gmra.mxu0 %vm1757_vm2, %v1700_v3  ;;  %v909_v24 = vadd.f32 %v908_v27, %v3079_v43  ;;  %v1153_v40 = vpack.c.bf16 %v1089_v7, %v1087_v49 }
 0x279   : > { %v1525_v0 = vpop.f32.mrf.mxu3 }
 0x27a   : > { %2369 = vmatmul.msk.bf16.gmra.mxu1 %vm521_vm1, %v2601_v9  ;;  %v1526_v11 = vadd.f32 %v1525_v0, %v1357_v51  ;;  %v1048_v50 = vmax.f32 %v909_v24, 0.0  ;;  %v3468_v0 = vpop.f32.mrf.mxu2  ;;  %v1367_v24 = vadd.f32 %v3235_v38, %v3328_v10 }
 0x27c   : > { %v1649_v25 = vmax.f32 %v1526_v11, 0.0 }
 0x27d   : > { %v1880_v46 = vpop.f32.mrf.mxu0 }
 0x27e   : > { %v1881_v29 = vadd.f32 %v3363_v34, %v1880_v46  ;;  %v2603_v46 = vld [vmem:[%s2776_s8 + $0xf8] sm:$0xff] }
 0x27f   : > { %v910_v2 = vpop.f32.mrf.mxu1 }
 0x280   : > { %2030 = vst [vmem:[%s3368_s21 + $0x38] sm:$0xff] %v1881_v29  ;;  %v911_v18 = vadd.f32 %v910_v2, %v3079_v43 }
 0x281   : > { %v1527_v55 = vpop.f32.mrf.mxu3 }
 0x282   : > { %v1050_v60 = vmax.f32 %v911_v18, 0.0  ;;  %v1528_v59 = vadd.f32 %v1527_v55, %v1359_v6 }
 0x284   : > { %v1134_v37 = vpack.c.bf16 %v1050_v60, %v1048_v50  ;;  %v1650_v48 = vmax.f32 %v1528_v59, 0.0 }
 0x285   : > { %v1883_v47 = vpop.f32.mrf.mxu0 }
 0x286   : > { %v1701_v30 = vpack.c.bf16 %v1650_v48, %v1649_v25  ;;  %v1884_v58 = vadd.f32 %v3363_v34, %v1883_v47  ;;  %1445 = vmatmul.bf16.gmra.mxu2 %v1151_v53  ;;  %1569 = vmatmul.bf16.gmra.mxu3 %v1134_v37 }
 0x287   : > { %v913_v21 = vpop.f32.mrf.mxu1 }
 0x288   : > { %2031 = vst [vmem:[%s3368_s21 + $0x40] sm:$0xff] %v1884_v58  ;;  %2464 = vmatmul.msk.bf16.gmra.mxu0 %vm1757_vm2, %v1701_v30  ;;  %v914_v26 = vadd.f32 %v913_v21, %v3079_v43  ;;  %v1372_v58 = vadd.f32 %v3235_v38, %v3349_v13 }
 0x289   : > { %v1530_v8 = vpop.f32.mrf.mxu3 }
 0x28a   : > { %2370 = vmatmul.msk.bf16.gmra.mxu1 %vm521_vm1, %v2602_v61  ;;  %v1531_v32 = vadd.f32 %v1530_v8, %v1362_v5  ;;  %v1052_v44 = vmax.f32 %v914_v26, 0.0 }
 0x28c   : > { %v1651_v42 = vmax.f32 %v1531_v32, 0.0 }
 0x28d   : > { %v1885_v19 = vpop.f32.mrf.mxu0 }
 0x28e   : > { %v1886_v12 = vadd.f32 %v3363_v34, %v1885_v19 }
 0x28f   : > { %v915_v28 = vpop.f32.mrf.mxu1 }
 0x290   : > { %2032 = vst [vmem:[%s3368_s21 + $0x48] sm:$0xff] %v1886_v12  ;;  %v916_v45 = vadd.f32 %v915_v28, %v3079_v43 }
 0x291   : > { %v1532_v17 = vpop.f32.mrf.mxu3 }
 0x292   : > { %v1054_v62 = vmax.f32 %v916_v45, 0.0  ;;  %v1533_v35 = vadd.f32 %v1532_v17, %v1364_v63 }
 0x294   : > { %v1136_v33 = vpack.c.bf16 %v1054_v62, %v1052_v44  ;;  %v1652_v3 = vmax.f32 %v1533_v35, 0.0  ;;  %v1377_v62 = vadd.f32 %v3235_v38, %v3384_v15 }
 0x295   : > { %v1888_v27 = vpop.f32.mrf.mxu0 }
 0x296   : > { %v1702_v9 = vpack.c.bf16 %v1652_v3, %v1651_v42  ;;  %v1889_v1 = vadd.f32 %v3363_v34, %v1888_v27  ;;  %1450 = vmatmul.bf16.gmra.mxu2 %v1153_v40  ;;  %1574 = vmatmul.bf16.gmra.mxu3 %v1136_v33  ;;  %v1379_v3 = vadd.f32 %v3235_v38, %v3391_v52 }
 0x297   : > { %v918_v39 = vpop.f32.mrf.mxu1 }
 0x298   : > { %2033 = vst [vmem:[%s3368_s21 + $0x50] sm:$0xff] %v1889_v1  ;;  %2465 = vmatmul.msk.bf16.gmra.mxu0 %vm1757_vm2, %v1702_v9  ;;  %v919_v29 = vadd.f32 %v918_v39, %v3079_v43 }
 0x299   : > { %v1535_v54 = vpop.f32.mrf.mxu3 }
 0x29a   : > { %2371 = vmatmul.msk.bf16.gmra.mxu1 %vm521_vm1, %v2603_v46  ;;  %v1536_v6 = vadd.f32 %v1535_v54, %v1367_v24  ;;  %v1056_v55 = vmax.f32 %v919_v29, 0.0 }
 0x29c   : > { %v1653_v59 = vmax.f32 %v1536_v6, 0.0 }
 0x29d   : > { %v1890_v51 = vpop.f32.mrf.mxu0 }
 0x29e   : > { %v1891_v20 = vadd.f32 %v3363_v34, %v1890_v51 }
 0x29f   : > { %v920_v2 = vpop.f32.mrf.mxu1 }
 0x2a0   : > { %2034 = vst [vmem:[%s3368_s21 + $0x58] sm:$0xff] %v1891_v20  ;;  %v921_v11 = vadd.f32 %v920_v2, %v3079_v43  ;;  %v3506_v2 = vpop.f32.mrf.mxu2 }
 0x2a1   : > { %v1537_v18 = vpop.f32.mrf.mxu3 }
 0x2a2   : > { %v1058_v50 = vmax.f32 %v921_v11, 0.0  ;;  %v1538_v60 = vadd.f32 %v1537_v18, %v1369_v4  ;;  %v1382_v11 = vadd.f32 %v3235_v38, %v3407_v41 }
 0x2a4   : > { %v1138_v25 = vpack.c.bf16 %v1058_v50, %v1056_v55  ;;  %v1654_v10 = vmax.f32 %v1538_v60, 0.0  ;;  %v1384_v60 = vadd.f32 %v3235_v38, %v3420_v57 }
 0x2a5   : > { %v1893_v37 = vpop.f32.mrf.mxu0 }
 0x2a6   : > { %v1703_v48 = vpack.c.bf16 %v1654_v10, %v1653_v59  ;;  %v1894_v53 = vadd.f32 %v3363_v34, %v1893_v37  ;;  %1579 = vmatmul.bf16.gmra.mxu3 %v1138_v25 }
 0x2a7   : > { %v923_v47 = vpop.f32.mrf.mxu1 }
 0x2a8   : > { %2035 = vst [vmem:[%s3368_s21 + $0x60] sm:$0xff] %v1894_v53  ;;  %2466 = vmatmul.msk.bf16.gmra.mxu0 %vm1757_vm2, %v1703_v48  ;;  %v924_v21 = vadd.f32 %v923_v47, %v3079_v43  ;;  %v3518_v10 = vpop.f32.mrf.mxu2 }
 0x2a9   : > { %v1540_v16 = vpop.f32.mrf.mxu3 }
 0x2aa   : > { %v1541_v31 = vadd.f32 %v1540_v16, %v1372_v58  ;;  %v1060_v26 = vmax.f32 %v924_v21, 0.0 }
 0x2ac   : > { %v1655_v28 = vmax.f32 %v1541_v31, 0.0 }
 0x2ad   : > { %v1895_v30 = vpop.f32.mrf.mxu0 }
 0x2ae   : > { %v1896_v8 = vadd.f32 %v3363_v34, %v1895_v30 }
 0x2af   : > { %v925_v61 = vpop.f32.mrf.mxu1 }
 0x2b0   : > { %2036 = vst [vmem:[%s3368_s21 + $0x68] sm:$0xff] %v1896_v8  ;;  %v926_v19 = vadd.f32 %v925_v61, %v3079_v43 }
 0x2b1   : > { %v1542_v5 = vpop.f32.mrf.mxu3 }
 0x2b2   : > { %v1062_v12 = vmax.f32 %v926_v19, 0.0  ;;  %v1543_v49 = vadd.f32 %v1542_v5, %v1374_v23  ;;  %v3523_v23 = vpop.f32.mrf.mxu2  ;;  %v1387_v19 = vadd.f32 %v3235_v38, %v3429_v56 }
 0x2b4   : > { %v1140_v7 = vpack.c.bf16 %v1062_v12, %v1060_v26  ;;  %v1656_v13 = vmax.f32 %v1543_v49, 0.0  ;;  %v1389_v49 = vadd.f32 %v3235_v38, %v3447_v36 }
 0x2b5   : > { %v1898_v63 = vpop.f32.mrf.mxu0 }
 0x2b6   : > { %v1704_v32 = vpack.c.bf16 %v1656_v13, %v1655_v28  ;;  %v1899_v45 = vadd.f32 %v3363_v34, %v1898_v63  ;;  %1584 = vmatmul.bf16.gmra.mxu3 %v1140_v7 }
 0x2b7   : > { %v928_v17 = vpop.f32.mrf.mxu1 }
 0x2b8   : > { %2037 = vst [vmem:[%s3368_s21 + $0x70] sm:$0xff] %v1899_v45  ;;  %2467 = vmatmul.msk.bf16.gmra.mxu0 %vm1757_vm2, %v1704_v32  ;;  %v929_v35 = vadd.f32 %v928_v17, %v3079_v43 }
 0x2b9   : > { %v1545_v22 = vpop.f32.mrf.mxu3 }
 0x2ba   : > { %v1546_v40 = vadd.f32 %v1545_v22, %v1377_v62  ;;  %v1064_v1 = vmax.f32 %v929_v35, 0.0 }
 0x2bc   : > { %v1657_v46 = vmax.f32 %v1546_v40, 0.0  ;;  %v1392_v40 = vadd.f32 %v3235_v38, %v3458_v14 }
 0x2bd   : > { %v1900_v44 = vpop.f32.mrf.mxu0 }
 0x2be   : > { %v1901_v42 = vadd.f32 %v3363_v34, %v1900_v44  ;;  %v3533_v44 = vpop.f32.mrf.mxu2 }
 0x2bf   : > { %v930_v33 = vpop.f32.mrf.mxu1 }
 0x2c0   : > { %2038 = vst [vmem:[%s3368_s21 + $0x78] sm:$0xff] %v1901_v42  ;;  %v931_v27 = vadd.f32 %v930_v33, %v3079_v43 }
 0x2c1   : > { %v1547_v9 = vpop.f32.mrf.mxu3 }
 0x2c2   : > { %v1066_v39 = vmax.f32 %v931_v27, 0.0  ;;  %v1548_v54 = vadd.f32 %v1547_v9, %v1379_v3 }
 0x2c4   : > { %v1142_v51 = vpack.c.bf16 %v1066_v39, %v1064_v1  ;;  %v1658_v15 = vmax.f32 %v1548_v54, 0.0  ;;  %v1394_v54 = vadd.f32 %v3235_v38, %v3468_v0 }
 0x2c5   : > { %v1903_v24 = vpop.f32.mrf.mxu0 }
 0x2c6   : > { %v1705_v29 = vpack.c.bf16 %v1658_v15, %v1657_v46  ;;  %v1904_v20 = vadd.f32 %v3363_v34, %v1903_v24  ;;  %1589 = vmatmul.bf16.gmra.mxu3 %v1142_v51  ;;  %v3542_v1 = vpop.f32.mrf.mxu2 }
 0x2c7   : > { %v933_v52 = vpop.f32.mrf.mxu1 }
 0x2c8   : > { %2039 = vst [vmem:[%s3368_s21 + $0x80] sm:$0xff] %v1904_v20  ;;  %2468 = vmatmul.msk.bf16.gmra.mxu0 %vm1757_vm2, %v1705_v29  ;;  %v934_v18 = vadd.f32 %v933_v52, %v3079_v43 }
 0x2c9   : > { %v1550_v4 = vpop.f32.mrf.mxu3 }
 0x2ca   : > { %v1551_v59 = vadd.f32 %v1550_v4, %v1382_v11  ;;  %v1068_v48 = vmax.f32 %v934_v18, 0.0 }
 0x2cc   : > { %v1659_v41 = vmax.f32 %v1551_v59, 0.0 }
 0x2cd   : > { %v1905_v6 = vpop.f32.mrf.mxu0 }
 0x2ce   : > { %v1906_v55 = vadd.f32 %v3363_v34, %v1905_v6  ;;  %v1408_v38 = vpop.f32.mrf.mxu2 }
 0x2cf   : > { %v935_v50 = vpop.f32.mrf.mxu1 }
 0x2d0   : > { %2040 = vst [vmem:[%s3368_s21 + $0x88] sm:$0xff] %v1906_v55  ;;  %v936_v25 = vadd.f32 %v935_v50, %v3079_v43 }
 0x2d1   : > { %v1552_v37 = vpop.f32.mrf.mxu3 }
 0x2d2   : > { %v1070_v53 = vmax.f32 %v936_v25, 0.0  ;;  %v1553_v47 = vadd.f32 %v1552_v37, %v1384_v60  ;;  %v3554_v60 = vld [vmem:[%s3731_s4] ss:$0 sm:$0xff] }
 0x2d3   : > { %v1397_v59 = vadd.f32 %v3554_v60, %v3506_v2 }
 0x2d4   : > { %v1144_v16 = vpack.c.bf16 %v1070_v53, %v1068_v48  ;;  %v1660_v30 = vmax.f32 %v1553_v47, 0.0  ;;  %v1399_v53 = vadd.f32 %v3554_v60, %v3518_v10 }
 0x2d5   : > { %v1908_v58 = vpop.f32.mrf.mxu0 }
 0x2d6   : > { %v1706_v21 = vpack.c.bf16 %v1660_v30, %v1659_v41  ;;  %v1909_v8 = vadd.f32 %v3363_v34, %v1908_v58  ;;  %1594 = vmatmul.bf16.gmra.mxu3 %v1144_v16 }
 0x2d7   : > { %v938_v57 = vpop.f32.mrf.mxu1 }
 0x2d8   : > { %2041 = vst [vmem:[%s3368_s21 + $0x90] sm:$0xff] %v1909_v8  ;;  %2469 = vmatmul.msk.bf16.gmra.mxu0 %vm1757_vm2, %v1706_v21  ;;  %v939_v5 = vadd.f32 %v938_v57, %v3079_v43  ;;  %v3564_v8 = vpop.f32.mrf.mxu2 }
 0x2d9   : > { %v1555_v61 = vpop.f32.mrf.mxu3 }
 0x2da   : > { %v1556_v28 = vadd.f32 %v1555_v61, %v1387_v19  ;;  %v1072_v63 = vmax.f32 %v939_v5, 0.0 }
 0x2dc   : > { %v1661_v17 = vmax.f32 %v1556_v28, 0.0  ;;  %v1402_v28 = vadd.f32 %v3554_v60, %v3523_v23 }
 0x2dd   : > { %v1910_v31 = vpop.f32.mrf.mxu0 }
 0x2de   : > { %v1911_v26 = vadd.f32 %v3363_v34, %v1910_v31 }
 0x2df   : > { %v940_v12 = vpop.f32.mrf.mxu1 }
 0x2e0   : > { %2042 = vst [vmem:[%s3368_s21 + $0x98] sm:$0xff] %v1911_v26  ;;  %v941_v7 = vadd.f32 %v940_v12, %v3079_v43  ;;  %v1413_v12 = vpop.f32.mrf.mxu2 }
 0x2e1   : > { %v1557_v13 = vpop.f32.mrf.mxu3 }
 0x2e2   : > { %v1074_v32 = vmax.f32 %v941_v7, 0.0  ;;  %v1558_v45 = vadd.f32 %v1557_v13, %v1389_v49 }
 0x2e4   : > { %v1146_v22 = vpack.c.bf16 %v1074_v32, %v1072_v63  ;;  %v1662_v56 = vmax.f32 %v1558_v45, 0.0  ;;  %v1404_v32 = vadd.f32 %v3554_v60, %v3533_v44 }
 0x2e5   : > { %v1913_v62 = vpop.f32.mrf.mxu0 }
 0x2e6   : > { %v1707_v35 = vpack.c.bf16 %v1662_v56, %v1661_v17  ;;  %v1914_v42 = vadd.f32 %v3363_v34, %v1913_v62  ;;  %1599 = vmatmul.bf16.gmra.mxu3 %v1146_v22 }
 0x2e7   : > { %v943_v36 = vpop.f32.mrf.mxu1 }
 0x2e8   : > { %2043 = vst [vmem:[%s3368_s21 + $0xa0] sm:$0xff] %v1914_v42  ;;  %2470 = vmatmul.msk.bf16.gmra.mxu0 %vm1757_vm2, %v1707_v35  ;;  %v944_v27 = vadd.f32 %v943_v36, %v3079_v43 }
 0x2e9   : > { %v1560_v33 = vpop.f32.mrf.mxu3 }
 0x2ea   : > { %v1561_v46 = vadd.f32 %v1560_v33, %v1392_v40  ;;  %v1076_v24 = vmax.f32 %v944_v27, 0.0  ;;  %v1416_v27 = vpop.f32.mrf.mxu2 }
 0x2ec   : > { %v1663_v14 = vmax.f32 %v1561_v46, 0.0 }
 0x2ed   : > { %v1915_v3 = vpop.f32.mrf.mxu0 }
 0x2ee   : > { %v1916_v9 = vadd.f32 %v3363_v34, %v1915_v3 }
 0x2ef   : > { %v945_v39 = vpop.f32.mrf.mxu1 }
 0x2f0   : > { %2044 = vst [vmem:[%s3368_s21 + $0xa8] sm:$0xff] %v1916_v9  ;;  %v946_v51 = vadd.f32 %v945_v39, %v3079_v43 }
 0x2f1   : > { %v1562_v15 = vpop.f32.mrf.mxu3 }
 0x2f2   : > { %v1078_v29 = vmax.f32 %v946_v51, 0.0  ;;  %v1563_v20 = vadd.f32 %v1562_v15, %v1394_v54  ;;  %v1407_v54 = vadd.f32 %v3554_v60, %v3542_v1 }
 0x2f4   : > { %v1148_v52 = vpack.c.bf16 %v1078_v29, %v1076_v24  ;;  %v1664_v4 = vmax.f32 %v1563_v20, 0.0  ;;  %v1409_v24 = vadd.f32 %v3554_v60, %v1408_v38 }
 0x2f5   : > { %v1918_v6 = vpop.f32.mrf.mxu0 }
 0x2f6   : > { %v1708_v11 = vpack.c.bf16 %v1664_v4, %v1663_v14  ;;  %v1919_v18 = vadd.f32 %v3363_v34, %v1918_v6  ;;  %1604 = vmatmul.bf16.gmra.mxu3 %v1148_v52  ;;  %v1418_v14 = vpop.f32.mrf.mxu2 }
 0x2f7   : > { %v948_v55 = vpop.f32.mrf.mxu1 }
 0x2f8   : > { %2045 = vst [vmem:[%s3368_s21 + $0xb0] sm:$0xff] %v1919_v18  ;;  %2471 = vmatmul.msk.bf16.gmra.mxu0 %vm1757_vm2, %v1708_v11  ;;  %v949_v25 = vadd.f32 %v948_v55, %v3079_v43 }
 0x2f9   : > { %v1565_v0 = vpop.f32.mrf.mxu3 }
 0x2fa   : > { %v1566_v47 = vadd.f32 %v1565_v0, %v1397_v59  ;;  %v1080_v30 = vmax.f32 %v949_v25, 0.0 }
 0x2fc   : > { %v1665_v2 = vmax.f32 %v1566_v47, 0.0 }
 0x2fd   : > { %v1920_v50 = vpop.f32.mrf.mxu0 }
 0x2fe   : > { %v1921_v37 = vadd.f32 %v3363_v34, %v1920_v50 }
 0x2ff   : > { %v950_v48 = vpop.f32.mrf.mxu1 }
 0x300   : > { %2046 = vst [vmem:[%s3368_s21 + $0xb8] sm:$0xff] %v1921_v37  ;;  %v951_v41 = vadd.f32 %v950_v48, %v3079_v43  ;;  %v1412_v37 = vadd.f32 %v3554_v60, %v3564_v8 }
 0x301   : > { %v1567_v16 = vpop.f32.mrf.mxu3 }
 0x302   : > { %v1082_v58 = vmax.f32 %v951_v41, 0.0  ;;  %v1568_v21 = vadd.f32 %v1567_v16, %v1399_v53  ;;  %v1414_v53 = vadd.f32 %v3554_v60, %v1413_v12 }
 0x304   : > { %v1150_v57 = vpack.c.bf16 %v1082_v58, %v1080_v30  ;;  %v1666_v61 = vmax.f32 %v1568_v21, 0.0 }
 0x305   : > { %v1923_v31 = vpop.f32.mrf.mxu0 }
 0x306   : > { %v1709_v19 = vpack.c.bf16 %v1666_v61, %v1665_v2  ;;  %v1924_v5 = vadd.f32 %v3363_v34, %v1923_v31  ;;  %1609 = vmatmul.bf16.gmra.mxu3 %v1150_v57 }
 0x307   : > { %v953_v10 = vpop.f32.mrf.mxu1 }
 0x308   : > { %2047 = vst [vmem:[%s3368_s21 + $0xc0] sm:$0xff] %v1924_v5  ;;  %2472 = vmatmul.msk.bf16.gmra.mxu0 %vm1757_vm2, %v1709_v19  ;;  %v954_v7 = vadd.f32 %v953_v10, %v3079_v43  ;;  %v1417_v19 = vadd.f32 %v3554_v60, %v1416_v27 }
 0x309   : > { %v1570_v26 = vpop.f32.mrf.mxu3 }
 0x30a   : > { %v1571_v45 = vadd.f32 %v1570_v26, %v1402_v28  ;;  %v1084_v56 = vmax.f32 %v954_v7, 0.0  ;;  %v1419_v26 = vadd.f32 %v3554_v60, %v1418_v14 }
 0x30c   : > { %v1667_v42 = vmax.f32 %v1571_v45, 0.0 }
 0x30d   : > { %v1925_v49 = vpop.f32.mrf.mxu0 }
 0x30e   : > { %v1926_v13 = vadd.f32 %v3363_v34, %v1925_v49 }
 0x30f   : > { %v955_v63 = vpop.f32.mrf.mxu1 }
 0x310   : > { %2048 = vst [vmem:[%s3368_s21 + $0xc8] sm:$0xff] %v1926_v13  ;;  %v956_v17 = vadd.f32 %v955_v63, %v3079_v43 }
 0x311   : > { %v1572_v22 = vpop.f32.mrf.mxu3 }
 0x312   : > { %v1086_v62 = vmax.f32 %v956_v17, 0.0  ;;  %v1573_v35 = vadd.f32 %v1572_v22, %v1404_v32 }
 0x314   : > { %v1152_v36 = vpack.c.bf16 %v1086_v62, %v1084_v56  ;;  %v1668_v23 = vmax.f32 %v1573_v35, 0.0 }
 0x315   : > { %v1928_v33 = vpop.f32.mrf.mxu0 }
 0x316   : > { %v1710_v3 = vpack.c.bf16 %v1668_v23, %v1667_v42  ;;  %v1929_v40 = vadd.f32 %v3363_v34, %v1928_v33  ;;  %1614 = vmatmul.bf16.gmra.mxu3 %v1152_v36 }
 0x317   : > { %v958_v44 = vpop.f32.mrf.mxu1 }
 0x318   : > { %2049 = vst [vmem:[%s3368_s21 + $0xd0] sm:$0xff] %v1929_v40  ;;  %2473 = vmatmul.msk.bf16.gmra.mxu0 %vm1757_vm2, %v1710_v3  ;;  %v959_v46 = vadd.f32 %v958_v44, %v3079_v43 }
 0x319   : > { %v1575_v9 = vpop.f32.mrf.mxu3 }
 0x31a   : > { %v1576_v29 = vadd.f32 %v1575_v9, %v1407_v54  ;;  %v1088_v4 = vmax.f32 %v959_v46, 0.0 }
 0x31c   : > { %v1669_v18 = vmax.f32 %v1576_v29, 0.0 }
 0x31d   : > { %v1930_v39 = vpop.f32.mrf.mxu0 }
 0x31e   : > { %v1931_v51 = vadd.f32 %v3363_v34, %v1930_v39 }
 0x31f   : > { %v960_v15 = vpop.f32.mrf.mxu1 }
 0x320   : > { %2050 = vst [vmem:[%s3368_s21 + $0xd8] sm:$0xff] %v1931_v51  ;;  %v961_v20 = vadd.f32 %v960_v15, %v3079_v43  ;;  %v1421_v43 = vpop.f32.mrf.mxu2 }
 0x321   : > { %v1577_v52 = vpop.f32.mrf.mxu3  ;;  %v1422_v62 = vadd.f32 %v3554_v60, %v1421_v43 }
 0x322   : > { %v1090_v6 = vmax.f32 %v961_v20, 0.0  ;;  %v1578_v11 = vadd.f32 %v1577_v52, %v1409_v24 }
 0x324   : > { %v1154_v1 = vpack.c.bf16 %v1090_v6, %v1088_v4  ;;  %v1670_v55 = vmax.f32 %v1578_v11, 0.0 }
 0x325   : > { %v1933_v0 = vpop.f32.mrf.mxu0 }
 0x326   : > { %v1711_v50 = vpack.c.bf16 %v1670_v55, %v1669_v18  ;;  %v1934_v59 = vadd.f32 %v3363_v34, %v1933_v0  ;;  %1619 = vmatmul.bf16.gmra.mxu3 %v1154_v1 }
 0x328   : > { %2051 = vst [vmem:[%s3368_s21 + $0xe0] sm:$0xff] %v1934_v59  ;;  %2474 = vmatmul.msk.bf16.gmra.mxu0 %vm1757_vm2, %v1711_v50  ;;  %v1423_v21 = vpop.f32.mrf.mxu2 }
 0x329   : > { %v1580_v38 = vpop.f32.mrf.mxu3  ;;  %v1424_v42 = vadd.f32 %v3554_v60, %v1423_v21 }
 0x32a   : > { %v1581_v47 = vadd.f32 %v1580_v38, %v1412_v37 }
 0x32c   : > { %v1671_v30 = vmax.f32 %v1581_v47, 0.0 }
 0x32d   : > { %v1935_v25 = vpop.f32.mrf.mxu0 }
 0x32e   : > { %v1936_v48 = vadd.f32 %v3363_v34, %v1935_v25 }
 0x330   : > { %2052 = vst [vmem:[%s3368_s21 + $0xe8] sm:$0xff] %v1936_v48  ;;  %v1426_v10 = vpop.f32.mrf.mxu2 }
 0x331   : > { %v1582_v41 = vpop.f32.mrf.mxu3  ;;  %v1427_v15 = vadd.f32 %v3554_v60, %v1426_v10 }
 0x332   : > { %v1583_v16 = vadd.f32 %v1582_v41, %v1414_v53 }
 0x334   : > { %v1672_v58 = vmax.f32 %v1583_v16, 0.0 }
 0x335   : > { %v1938_v2 = vpop.f32.mrf.mxu0 }
 0x336   : > { %v1712_v57 = vpack.c.bf16 %v1672_v58, %v1671_v30  ;;  %v1939_v61 = vadd.f32 %v3363_v34, %v1938_v2 }
 0x338   : > { %2053 = vst [vmem:[%s3368_s21 + $0xf0] sm:$0xff] %v1939_v61  ;;  %2475 = vmatmul.msk.bf16.gmra.mxu0 %vm1757_vm2, %v1712_v57  ;;  %v1428_v17 = vpop.f32.mrf.mxu2 }
 0x339   : > { %v1585_v8 = vpop.f32.mrf.mxu3  ;;  %v1429_v29 = vadd.f32 %v3554_v60, %v1428_v17  ;;  %v3637_v17 = vld [vmem:[%s3733_s6] ss:$0 sm:$0xff] }
 0x33a   : > { %v1586_v12 = vadd.f32 %v1585_v8, %v1417_v19 }
 0x33c   : > { %v1673_v7 = vmax.f32 %v1586_v12, 0.0 }
 0x33d   : > { %v1940_v31 = vpop.f32.mrf.mxu0 }
 0x33e   : > { %v1941_v5 = vadd.f32 %v3363_v34, %v1940_v31 }
 0x340   : > { %2054 = vst [vmem:[%s3368_s21 + $0xf8] sm:$0xff] %v1941_v5  ;;  %v1431_v3 = vpop.f32.mrf.mxu2 }
 0x341   : > { %v1587_v49 = vpop.f32.mrf.mxu3  ;;  %v1432_v59 = vadd.f32 %v3554_v60, %v1431_v3 }
 0x342   : > { %v1588_v28 = vadd.f32 %v1587_v49, %v1419_v26 }
 0x344   : > { %v1674_v13 = vmax.f32 %v1588_v28, 0.0 }
 0x345   : > { %v1943_v63 = vpop.f32.mrf.mxu0 }
 0x346   : > { %v1713_v32 = vpack.c.bf16 %v1674_v13, %v1673_v7  ;;  %v1944_v45 = vadd.f32 %v3363_v34, %v1943_v63 }
 0x348   : > { %2055 = vst [vmem:[%s3368_s21 + $0x100] sm:$0xff] %v1944_v45  ;;  %2476 = vmatmul.msk.bf16.gmra.mxu0 %vm1757_vm2, %v1713_v32  ;;  %v1433_v46 = vpop.f32.mrf.mxu2 }
 0x349   : > { %v1590_v22 = vpop.f32.mrf.mxu3  ;;  %v1434_v43 = vadd.f32 %v3554_v60, %v1433_v46 }
 0x34a   : > { %v1591_v36 = vadd.f32 %v1590_v22, %v1422_v62 }
 0x34c   : > { %v1675_v40 = vmax.f32 %v1591_v36, 0.0 }
 0x34d   : > { %v1945_v56 = vpop.f32.mrf.mxu0 }
 0x34e   : > { %v1946_v35 = vadd.f32 %v3363_v34, %v1945_v56 }
 0x350   : > { %2056 = vst [vmem:[%s3368_s21 + $0x108] sm:$0xff] %v1946_v35  ;;  %v1436_v55 = vpop.f32.mrf.mxu2 }
 0x351   : > { %v1592_v23 = vpop.f32.mrf.mxu3  ;;  %v1437_v61 = vadd.f32 %v3554_v60, %v1436_v55 }
 0x352   : > { %v1593_v33 = vadd.f32 %v1592_v23, %v1424_v42 }
 0x354   : > { %v1676_v27 = vmax.f32 %v1593_v33, 0.0 }
 0x355   : > { %v1948_v44 = vpop.f32.mrf.mxu0 }
 0x356   : > { %v1714_v9 = vpack.c.bf16 %v1676_v27, %v1675_v40  ;;  %v1949_v39 = vadd.f32 %v3363_v34, %v1948_v44 }
 0x358   : > { %2057 = vst [vmem:[%s3368_s21 + $0x110] sm:$0xff] %v1949_v39  ;;  %2477 = vmatmul.msk.bf16.gmra.mxu0 %vm1757_vm2, %v1714_v9  ;;  %v1438_v37 = vpop.f32.mrf.mxu2 }
 0x359   : > { %v1595_v54 = vpop.f32.mrf.mxu3  ;;  %v1439_v31 = vadd.f32 %v3554_v60, %v1438_v37 }
 0x35a   : > { %v1596_v20 = vadd.f32 %v1595_v54, %v1427_v15 }
 0x35c   : > { %v1677_v4 = vmax.f32 %v1596_v20, 0.0 }
 0x35d   : > { %v1950_v51 = vpop.f32.mrf.mxu0 }
 0x35e   : > { %v1951_v24 = vadd.f32 %v3363_v34, %v1950_v51 }
 0x360   : > { %2058 = vst [vmem:[%s3368_s21 + $0x118] sm:$0xff] %v1951_v24  ;;  %v1441_v2 = vpop.f32.mrf.mxu2 }
 0x361   : > { %v1597_v14 = vpop.f32.mrf.mxu3  ;;  %v1442_v45 = vadd.f32 %v3554_v60, %v1441_v2 }
 0x362   : > { %v1598_v52 = vadd.f32 %v1597_v14, %v1429_v29 }
 0x364   : > { %v1678_v6 = vmax.f32 %v1598_v52, 0.0 }
 0x365   : > { %v1953_v11 = vpop.f32.mrf.mxu0 }
 0x366   : > { %v1715_v18 = vpack.c.bf16 %v1678_v6, %v1677_v4  ;;  %v1954_v1 = vadd.f32 %v3363_v34, %v1953_v11 }
 0x368   : > { %2059 = vst [vmem:[%s3368_s21 + $0x120] sm:$0xff] %v1954_v1  ;;  %2478 = vmatmul.msk.bf16.gmra.mxu0 %vm1757_vm2, %v1715_v18  ;;  %v1443_v49 = vpop.f32.mrf.mxu2 }
 0x369   : > { %v1600_v0 = vpop.f32.mrf.mxu3  ;;  %v1444_v62 = vadd.f32 %v3554_v60, %v1443_v49 }
 0x36a   : > { %v1601_v25 = vadd.f32 %v1600_v0, %v1432_v59 }
 0x36c   : > { %v1679_v47 = vmax.f32 %v1601_v25, 0.0 }
 0x36d   : > { %v1955_v50 = vpop.f32.mrf.mxu0 }
 0x36e   : > { %v1956_v38 = vadd.f32 %v3363_v34, %v1955_v50 }
 0x370   : > { %2060 = vst [vmem:[%s3368_s21 + $0x128] sm:$0xff] %v1956_v38  ;;  %v1446_v56 = vpop.f32.mrf.mxu2 }
 0x371   : > { %v1602_v48 = vpop.f32.mrf.mxu3  ;;  %v1447_v39 = vadd.f32 %v3554_v60, %v1446_v56 }
 0x372   : > { %v1603_v53 = vadd.f32 %v1602_v48, %v1434_v43 }
 0x374   : > { %v1680_v41 = vmax.f32 %v1603_v53, 0.0 }
 0x375   : > { %v1958_v16 = vpop.f32.mrf.mxu0 }
 0x376   : > { %v1716_v30 = vpack.c.bf16 %v1680_v41, %v1679_v47  ;;  %v1959_v58 = vadd.f32 %v3363_v34, %v1958_v16 }
 0x378   : > { %2061 = vst [vmem:[%s3368_s21 + $0x130] sm:$0xff] %v1959_v58  ;;  %2479 = vmatmul.msk.bf16.gmra.mxu0 %vm1757_vm2, %v1716_v30  ;;  %v1448_v27 = vpop.f32.mrf.mxu2 }
 0x379   : > { %v1605_v21 = vpop.f32.mrf.mxu3  ;;  %v1449_v46 = vadd.f32 %v3554_v60, %v1448_v27 }
 0x37a   : > { %v1606_v19 = vadd.f32 %v1605_v21, %v1437_v61 }
 0x37c   : > { %v1681_v26 = vmax.f32 %v1606_v19, 0.0 }
 0x37d   : > { %v1960_v57 = vpop.f32.mrf.mxu0 }
 0x37e   : > { %v1961_v8 = vadd.f32 %v3363_v34, %v1960_v57 }
 0x380   : > { %2062 = vst [vmem:[%s3368_s21 + $0x138] sm:$0xff] %v1961_v8  ;;  %v1451_v29 = vpop.f32.mrf.mxu2 }
 0x381   : > { %v1607_v5 = vpop.f32.mrf.mxu3  ;;  %v1452_v55 = vadd.f32 %v3554_v60, %v1451_v29 }
 0x382   : > { %v1608_v10 = vadd.f32 %v1607_v5, %v1439_v31 }
 0x384   : > { %v1682_v12 = vmax.f32 %v1608_v10, 0.0 }
 0x385   : > { %v1963_v28 = vpop.f32.mrf.mxu0 }
 0x386   : > { %v1717_v7 = vpack.c.bf16 %v1682_v12, %v1681_v26  ;;  %v1964_v13 = vadd.f32 %v3363_v34, %v1963_v28 }
 0x388   : > { %2063 = vst [vmem:[%s3368_s21 + $0x140] sm:$0xff] %v1964_v13  ;;  %2480 = vmatmul.msk.bf16.gmra.mxu0 %vm1757_vm2, %v1717_v7  ;;  %v1453_v18 = vpop.f32.mrf.mxu2 }
 0x389   : > { %v1610_v63 = vpop.f32.mrf.mxu3  ;;  %v1454_v50 = vadd.f32 %v3554_v60, %v1453_v18 }
 0x38a   : > { %v1611_v35 = vadd.f32 %v1610_v63, %v1442_v45 }
 0x38c   : > { %v1683_v36 = vmax.f32 %v1611_v35, 0.0 }
 0x38d   : > { %v1965_v32 = vpop.f32.mrf.mxu0 }
 0x38e   : > { %v1966_v22 = vadd.f32 %v3637_v17, %v1965_v32 }
 0x390   : > { %2064 = vst [vmem:[%s3368_s21 + $0x148] sm:$0xff] %v1966_v22 }
 0x391   : > { %v1612_v34 = vpop.f32.mrf.mxu3 }
 0x392   : > { %v1613_v42 = vadd.f32 %v1612_v34, %v1444_v62 }
 0x394   : > { %v1684_v23 = vmax.f32 %v1613_v42, 0.0 }
 0x395   : > { %v1968_v33 = vpop.f32.mrf.mxu0 }
 0x396   : > { %v1718_v3 = vpack.c.bf16 %v1684_v23, %v1683_v36  ;;  %v1969_v40 = vadd.f32 %v3637_v17, %v1968_v33 }
 0x398   : > { %2065 = vst [vmem:[%s3368_s21 + $0x150] sm:$0xff] %v1969_v40  ;;  %2481 = vmatmul.msk.bf16.gmra.mxu0 %vm1757_vm2, %v1718_v3 }
 0x399   : > { %v1615_v44 = vpop.f32.mrf.mxu3 }
 0x39a   : > { %v1616_v51 = vadd.f32 %v1615_v44, %v1447_v39 }
 0x39c   : > { %v1685_v20 = vmax.f32 %v1616_v51, 0.0 }
 0x39d   : > { %v1970_v9 = vpop.f32.mrf.mxu0 }
 0x39e   : > { %v1971_v54 = vadd.f32 %v3637_v17, %v1970_v9 }
 0x3a0   : > { %2066 = vst [vmem:[%s3368_s21 + $0x158] sm:$0xff] %v1971_v54 }
 0x3a1   : > { %v1617_v15 = vpop.f32.mrf.mxu3 }
 0x3a2   : > { %v1618_v24 = vadd.f32 %v1617_v15, %v1449_v46 }
 0x3a4   : > { %v1686_v14 = vmax.f32 %v1618_v24, 0.0 }
 0x3a5   : > { %v1973_v52 = vpop.f32.mrf.mxu0 }
 0x3a6   : > { %v1719_v4 = vpack.c.bf16 %v1686_v14, %v1685_v20  ;;  %v1974_v6 = vadd.f32 %v3637_v17, %v1973_v52 }
 0x3a8   : > { %2067 = vst [vmem:[%s3368_s21 + $0x160] sm:$0xff] %v1974_v6  ;;  %2482 = vmatmul.msk.bf16.gmra.mxu0 %vm1757_vm2, %v1719_v4 }
 0x3a9   : > { %v1620_v11 = vpop.f32.mrf.mxu3 }
 0x3aa   : > { %v1621_v59 = vadd.f32 %v1620_v11, %v1452_v55 }
 0x3ac   : > { %v1687_v25 = vmax.f32 %v1621_v59, 0.0 }
 0x3ad   : > { %v1975_v1 = vpop.f32.mrf.mxu0 }
 0x3ae   : > { %v1976_v0 = vadd.f32 %v3637_v17, %v1975_v1 }
 0x3b0   : > { %2068 = vst [vmem:[%s3368_s21 + $0x168] sm:$0xff] %v1976_v0 }
 0x3b1   : > { %v1622_v38 = vpop.f32.mrf.mxu3 }
 0x3b2   : > { %v1623_v43 = vadd.f32 %v1622_v38, %v1454_v50 }
 0x3b4   : > { %v1688_v37 = vmax.f32 %v1623_v43, 0.0 }
 0x3b5   : > { %v1978_v48 = vpop.f32.mrf.mxu0 }
 0x3b6   : > { %v1720_v53 = vpack.c.bf16 %v1688_v37, %v1687_v25  ;;  %v1979_v47 = vadd.f32 %v3637_v17, %v1978_v48 }
 0x3b8   : > { %2069 = vst [vmem:[%s3368_s21 + $0x170] sm:$0xff] %v1979_v47  ;;  %2483 = vmatmul.msk.bf16.vlgmr.msra.gmra.mxu3 %vm1757_vm2, %v1720_v53 }
 0x3bd   : > { %v1980_v41 = vpop.f32.mrf.mxu0 }
 0x3be   : > { %v1981_v60 = vadd.f32 %v3637_v17, %v1980_v41 }
 0x3c0   : > { %2070 = vst [vmem:[%s3368_s21 + $0x178] sm:$0xff] %v1981_v60 }
 0x3c5   : > { %v1983_v16 = vpop.f32.mrf.mxu0 }
 0x3c6   : > { %v1984_v30 = vadd.f32 %v3637_v17, %v1983_v16 }
 0x3c8   : > { %2071 = vst [vmem:[%s3368_s21 + $0x180] sm:$0xff] %v1984_v30 }
 0x3cd   : > { %v1985_v58 = vpop.f32.mrf.mxu0 }
 0x3ce   : > { %v1986_v21 = vadd.f32 %v3637_v17, %v1985_v58 }
 0x3d0   : > { %2072 = vst [vmem:[%s3368_s21 + $0x188] sm:$0xff] %v1986_v21 }
 0x3d5   : > { %v1988_v2 = vpop.f32.mrf.mxu0 }
 0x3d6   : > { %v1989_v57 = vadd.f32 %v3637_v17, %v1988_v2 }
 0x3d8   : > { %2073 = vst [vmem:[%s3368_s21 + $0x190] sm:$0xff] %v1989_v57 }
 0x3dd   : > { %v1990_v61 = vpop.f32.mrf.mxu0 }
 0x3de   : > { %v1991_v8 = vadd.f32 %v3637_v17, %v1990_v61 }
 0x3e0   : > { %2074 = vst [vmem:[%s3368_s21 + $0x198] sm:$0xff] %v1991_v8 }
 0x3e5   : > { %v1993_v31 = vpop.f32.mrf.mxu0 }
 0x3e6   : > { %v1994_v19 = vadd.f32 %v3637_v17, %v1993_v31 }
 0x3e8   : > { %2075 = vst [vmem:[%s3368_s21 + $0x1a0] sm:$0xff] %v1994_v19 }
 0x3ed   : > { %v1995_v5 = vpop.f32.mrf.mxu0 }
 0x3ee   : > { %v1996_v10 = vadd.f32 %v3637_v17, %v1995_v5 }
 0x3f0   : > { %2076 = vst [vmem:[%s3368_s21 + $0x1a8] sm:$0xff] %v1996_v10 }
 0x3f5   : > { %v1998_v26 = vpop.f32.mrf.mxu0 }
 0x3f6   : > { %v1999_v12 = vadd.f32 %v3637_v17, %v1998_v26 }
 0x3f8   : > { %2077 = vst [vmem:[%s3368_s21 + $0x1b0] sm:$0xff] %v1999_v12 }
 0x3fd   : > { %v2000_v49 = vpop.f32.mrf.mxu0 }
 0x3fe   : > { %v2001_v28 = vadd.f32 %v3637_v17, %v2000_v49 }
 0x400   : > { %2078 = vst [vmem:[%s3368_s21 + $0x1b8] sm:$0xff] %v2001_v28 }
 0x405   : > { %v2003_v7 = vpop.f32.mrf.mxu0 }
 0x406   : > { %v2004_v13 = vadd.f32 %v3637_v17, %v2003_v7 }
 0x408   : > { %2079 = vst [vmem:[%s3368_s21 + $0x1c0] sm:$0xff] %v2004_v13 }
 0x40d   : > { %v2005_v63 = vpop.f32.mrf.mxu0 }
 0x40e   : > { %v2006_v32 = vadd.f32 %v3637_v17, %v2005_v63 }
 0x410   : > { %2080 = vst [vmem:[%s3368_s21 + $0x1c8] sm:$0xff] %v2006_v32 }
 0x415   : > { %v2008_v45 = vpop.f32.mrf.mxu0 }
 0x416   : > { %v2009_v22 = vadd.f32 %v3637_v17, %v2008_v45 }
 0x418   : > { %2081 = vst [vmem:[%s3368_s21 + $0x1d0] sm:$0xff] %v2009_v22 }
 0x41d   : > { %v2010_v56 = vpop.f32.mrf.mxu0 }
 0x41e   : > { %v2011_v62 = vadd.f32 %v3637_v17, %v2010_v56 }
 0x420   : > { %2082 = vst [vmem:[%s3368_s21 + $0x1d8] sm:$0xff] %v2011_v62 }
 0x425   : > { %v2013_v35 = vpop.f32.mrf.mxu0 }
 0x426   : > { %v2014_v34 = vadd.f32 %v3637_v17, %v2013_v35 }
 0x428   : > { %2083 = vst [vmem:[%s3368_s21 + $0x1e0] sm:$0xff] %v2014_v34 }
 0x42d   : > { %v2015_v42 = vpop.f32.mrf.mxu0 }
 0x42e   : > { %v2016_v36 = vadd.f32 %v3637_v17, %v2015_v42 }
 0x430   : > { %2084 = vst [vmem:[%s3368_s21 + $0x1e8] sm:$0xff] %v2016_v36 }
 0x43b   : > { %v2018_v23 = vpop.f32.mrf.mxu3 }
 0x43c   : > { %v2019_v33 = vadd.f32 %v3637_v17, %v2018_v23 }
 0x43e   : > { %2085 = vst [vmem:[%s3368_s21 + $0x1f0] sm:$0xff] %v2019_v33 }
 0x443   : > { %v2020_v3 = vpop.f32.mrf.mxu3 }
 0x444   : > { %v2021_v40 = vadd.f32 %v3637_v17, %v2020_v3 }
 0x446   : > { %2086 = vst [vmem:[%s3368_s21 + $0x1f8] sm:$0xff] %v2021_v40 }
 0x447   : > { %2633 = shalt.err (!%p2630_p3)
}
 0x448   : > { %s2670_s17 = smov 128   ;;  %s2671_s21 = smov 8  }
 0x449   : > { %2551 = dma.vmem_to_hbm [thread:$0]  (%p2750_p5), %s2101_s16, 8192, %s2103_s18, %s2088_s19, %s2670_s17, %s2670_s17, %s2671_s21  }
 0x44a PF: > { %p2557_p4 = scmp.ge.s32.totalorder %s2668_s27, 2  ;;  %s2117_s13 = sand.u32 1, %s2656_s24  }
 0x44b   : > { %s2118_s14 = scalar_lea.sflag [#allocation3], %s2117_s13 }
 0x44c   : > { %p2554_p7 = pnand %p2557_p4, %p2754_p6 }
 0x44e   : > { %p2555_p8 = pneg %p2554_p7 }
 0x450   : > { %2651 = dma.done.wait (%p2555_p8), %s2118_s14, 8192  }
 0x451   : > { %2653 = vsyncadd (%p2555_p8), %s2118_s14, 4294959104  ;;  %p17_p9 = scmp.ge.s32.totalorder %s2737_s30, 4   ;;  %s3737_s24 = smov %s2660_s25 }
 0x452   : > { %s3738_s25 = smov %s2664_s26  ;;  %s3739_s26 = smov %s2748_s10 }
 0x453   : > { %s3740_s27 = smov %s2737_s30  ;;  %19 = sbr.rel (!%p17_p9) target bundleno = 3 (0x3), region = 83 }
 0x458   :  { %2124 = vsyncpa [#allocation3], 1 }
 0x459   :  { %2126 = vsyncpa [#allocation3 + $0x1], 1 }

</bundles_post_ra>
